<compile_context>
chip_gen: v6e
topology: v6e:2x2x1
jax: 0.10.0
libtpu: 0.0.40
codegen_flags: <defaults>
</compile_context>

<pallas_src>
import functools
import math

import jax
import jax.numpy as jnp
import numpy as np
from jax.experimental import pallas as pl
from jax.experimental.pallas import tpu as pltpu

KSIZE = 7
PAD = 3  # "same" padding for kernel_size=7
KK = KSIZE * KSIZE


def _spatial_attention_kernel(x_ref, wmask_ref, o_ref, *, H, W, C, B):
    # x_ref:     (B, C, HW)       VMEM block, B batch elements, lane-dense
    # wmask_ref: (KK, 2*B, HW)    VMEM constant: weight-folded boundary masks
    #                             rows [0:B) = w_avg[t]*mask, [B:2B) = w_max[t]*mask
    # o_ref:     (B, 1, HW)       VMEM output block
    HW = H * W
    inv_c = jnp.float32(1.0 / C)

    # ---- vectorized channel mean + max: one dense (C, HW) load per batch,
    #      sublane-axis reduces (XLU), no per-channel VALU chain ----
    avg_rows = []
    mx_rows = []
    for b in range(B):  # B is tiny (<=4); static unroll
        xb = x_ref[b].astype(jnp.float32)                     # (C, HW) dense load
        avg_rows.append(jnp.sum(xb, axis=0, keepdims=True) * inv_c)
        mx_rows.append(jnp.max(xb, axis=0, keepdims=True))
    # Stack all planes along the sublane axis: rows [avg_0..avg_{B-1}, mx_0..mx_{B-1}]
    planes = jnp.concatenate(avg_rows + mx_rows, axis=0)      # (2*B, HW)

    # ---- 7x7 "same" conv in the flat layout ----
    # out[i*W+j] = sum_t w_avg[t]*avg[i+di, j+dj] + w_max[t]*mx[i+di, j+dj]
    # with di = ki-PAD, dj = kj-PAD.  A valid neighbour in the flattened plane
    # is a shift by di*W + dj; wrapped (out-of-bounds) neighbours are zeroed
    # by the 0/1 boundary mask that is already folded into wmask.
    acc = jnp.zeros((2 * B, HW), jnp.float32)
    for ki in range(KSIZE):
        for kj in range(KSIZE):
            t = ki * KSIZE + kj
            shift = (ki - PAD) * W + (kj - PAD)                # flat neighbour offset
            if shift == 0:
                p = planes
            else:
                # gather: p[q] = planes[(q + shift) % HW]  (jnp.roll semantics)
                p = pltpu.roll(planes, shift=(-shift) % HW, axis=1)
            acc = acc + p * wmask_ref[t]                       # 1 roll + 1 mul + 1 add / tap

    out = acc[:B] + acc[B:]                                    # combine avg/max halves
    o_ref[:, 0, :] = jax.nn.sigmoid(out).astype(o_ref.dtype)


def _boundary_masks(H, W):
    """(KK, H*W) float32 0/1 masks: mask[ki*K+kj, i*W+j] == 1 iff the
    neighbour (i+ki-PAD, j+kj-PAD) lies inside the H x W plane."""
    qi = np.arange(H * W) // W
    qj = np.arange(H * W) % W
    masks = np.zeros((KK, H * W), np.float32)
    for ki in range(KSIZE):
        for kj in range(KSIZE):
            di, dj = ki - PAD, kj - PAD
            ok = (qi + di >= 0) & (qi + di < H) & (qj + dj >= 0) & (qj + dj < W)
            masks[ki * KSIZE + kj] = ok.astype(np.float32)
    return masks


def _pick_batch_block(N):
    """Batches per grid step: pack sublanes (up to 4 -> 8 plane rows) but keep
    grid >= 2 whenever N >= 2 so both v7x TensorCores get work."""
    best = 1
    for b in (2, 3, 4):
        if N % b == 0 and N // b >= 2:
            best = b
    return best


def spatial_attention(x, w):
    """x: (N, C, H, W) float32, w: (2, K, K) float32 -> (N, 1, H, W)."""
    N, C, H, W = x.shape
    HW = H * W
    B = _pick_batch_block(N)
    G = N // B

    x_flat = x.reshape(N, C, HW)                       # lane-dense last dim

    # Weight-folded boundary-mask table: (KK, 2*B, HW)
    masks = jnp.asarray(_boundary_masks(H, W))                     # (KK, HW)
    w2 = w.reshape(2, KK).astype(jnp.float32)                      # (2, KK)
    wm = w2[:, :, None] * masks[None, :, :]                        # (2, KK, HW)
    wm = jnp.transpose(wm, (1, 0, 2))                              # (KK, 2, HW)
    wm = jnp.broadcast_to(wm[:, :, None, :], (KK, 2, B, HW)).reshape(KK, 2 * B, HW)

    # Explicit scoped-VMEM budget: 2x per operand for Pallas double buffering
    # (x block, wmask block, out block) + headroom.  Cap generation-safely
    # (v7x has 64 MiB physical VMEM; v5e/v6e have 128 MiB).
    itemsize = jnp.dtype(x.dtype).itemsize
    x_block = B * C * HW * itemsize
    o_block = B * 1 * HW * itemsize
    wm_block = KK * 2 * B * HW * 4
    need = 2 * (x_block + o_block + wm_block) + (2 << 20)
    vmem_limit = int(min(max(need, 16 << 20), 64 << 20))

    kernel = functools.partial(_spatial_attention_kernel, H=H, W=W, C=C, B=B)

    # Block shapes: trailing two dims are always the full array dims (C, HW),
    # (2*B, HW), (1, HW), so every block is legal and lane-dense (HW = k*128).
    out_flat = pl.pallas_call(
        kernel,
        out_shape=jax.ShapeDtypeStruct((N, 1, HW), x.dtype),
        grid=(G,),
        in_specs=[
            pl.BlockSpec((B, C, HW), lambda n: (n, 0, 0)),
            # Constant block every step (weight-folded mask table).
            pl.BlockSpec((KK, 2 * B, HW), lambda n: (0, 0, 0)),
        ],
        out_specs=pl.BlockSpec((B, 1, HW), lambda n: (n, 0, 0)),
        compiler_params=pltpu.CompilerParams(
            dimension_semantics=("parallel",),
            vmem_limit_bytes=vmem_limit,
        ),
    )(x_flat, wm)

    return out_flat.reshape(N, 1, H, W)


def reference(x, w):
    avg = jnp.mean(x, axis=1, keepdims=True)
    mx = jnp.max(x, axis=1, keepdims=True)
    xc = jnp.concatenate([avg, mx], axis=1)
    y = jax.lax.conv_general_dilated(
        xc, w[None],  # (O=1, I=2, K, K)
        window_strides=(1, 1),
        padding=((PAD, PAD), (PAD, PAD)),
        dimension_numbers=("NCHW", "OIHW", "NCHW"),
    )
    return jax.nn.sigmoid(y)


if __name__ == "__main__":
    key = jax.random.PRNGKey(0)
    kx, kw = jax.random.split(key)

    N, C, H, W = 2, 4, 16, 16
    x = jax.random.normal(kx, (N, C, H, W), dtype=jnp.float32)

    # Deterministic conv1 weight init, mimicking PyTorch's default
    # kaiming-uniform bound: U(-1/sqrt(fan_in), 1/sqrt(fan_in)), fan_in = 2*7*7.
    fan_in = 2 * KSIZE * KSIZE
    bound = 1.0 / math.sqrt(fan_in)
    w = jax.random.uniform(kw, (2, KSIZE, KSIZE), dtype=jnp.float32,
                           minval=-bound, maxval=bound)

    out = spatial_attention(x, w)
    jax.block_until_ready(out)

    ref = reference(x, w)
    assert out.shape == (N, 1, H, W)
    assert jnp.allclose(out, ref, atol=1e-5, rtol=1e-5), "mismatch vs JAX reference"

    print("KERNEL_OK")
</pallas_src>

<mosaic_0001>
module attributes {stable_mosaic.version = 11 : i64} {
  func.func @_spatial_attention_kernel(%arg0: i32, %arg1: memref<1x4x256xf32, #tpu.memory_space<vmem>>, %arg2: memref<49x2x256xf32, #tpu.memory_space<vmem>>, %arg3: memref<1x1x256xf32, #tpu.memory_space<vmem>>) attributes {dimension_semantics = [#tpu.dimension_semantics<parallel>], iteration_bounds = array<i64: 2>, scalar_prefetch = 0 : i64, scratch_operands = 0 : i64, tpu.core_type = #tpu.core_type<tc>, window_params = [{transform_indices = @transform_0, window_bounds = array<i64: 1, 4, 256>}, {pipeline_mode = #tpu.pipeline_mode<synchronous>, transform_indices = @transform_1, window_bounds = array<i64: 49, 2, 256>}, {transform_indices = @transform_2, window_bounds = array<i64: 1, 1, 256>}]} {
    %c0 = arith.constant 0 : index
    %c0_0 = arith.constant 0 : index
    %c0_1 = arith.constant 0 : index
    %0 = vector.load %arg1[%c0, %c0_0, %c0_1] : memref<1x4x256xf32, #tpu.memory_space<vmem>>, vector<1x4x256xf32>
    %1 = vector.shape_cast %0 : vector<1x4x256xf32> to vector<4x256xf32>
    %cst = arith.constant dense<0.000000e+00> : vector<256xf32>
    %2 = vector.multi_reduction <add>, %1, %cst [0] : vector<4x256xf32> to vector<256xf32>
    %3 = vector.shape_cast %2 : vector<256xf32> to vector<1x256xf32>
    %cst_2 = arith.constant 2.500000e-01 : f32
    %4 = vector.broadcast %cst_2 : f32 to vector<1x256xf32>
    %5 = arith.mulf %3, %4 : vector<1x256xf32>
    %cst_3 = arith.constant dense<0xFF800000> : vector<256xf32>
    %6 = vector.multi_reduction <maximumf>, %1, %cst_3 [0] : vector<4x256xf32> to vector<256xf32>
    %7 = vector.shape_cast %6 : vector<256xf32> to vector<1x256xf32>
    %8 = tpu.concatenate %5, %7 in 0 : vector<1x256xf32>, vector<1x256xf32> -> vector<2x256xf32>
    %cst_4 = arith.constant 0.000000e+00 : f32
    %9 = vector.broadcast %cst_4 : f32 to vector<2x256xf32>
    %c51_i32 = arith.constant 51 : i32
    %10 = tpu.dynamic_rotate %8 by %c51_i32 dim 1 : vector<2x256xf32>, i32 -> vector<2x256xf32>
    %c0_5 = arith.constant 0 : index
    %c0_6 = arith.constant 0 : index
    %c0_7 = arith.constant 0 : index
    %11 = vector.load %arg2[%c0_5, %c0_6, %c0_7] : memref<49x2x256xf32, #tpu.memory_space<vmem>>, vector<1x2x256xf32>
    %12 = vector.shape_cast %11 : vector<1x2x256xf32> to vector<2x256xf32>
    %13 = arith.mulf %10, %12 : vector<2x256xf32>
    %14 = arith.addf %9, %13 : vector<2x256xf32>
    %c50_i32 = arith.constant 50 : i32
    %15 = tpu.dynamic_rotate %8 by %c50_i32 dim 1 : vector<2x256xf32>, i32 -> vector<2x256xf32>
    %c1 = arith.constant 1 : index
    %c0_8 = arith.constant 0 : index
    %c0_9 = arith.constant 0 : index
    %16 = vector.load %arg2[%c1, %c0_8, %c0_9] : memref<49x2x256xf32, #tpu.memory_space<vmem>>, vector<1x2x256xf32>
    %17 = vector.shape_cast %16 : vector<1x2x256xf32> to vector<2x256xf32>
    %18 = arith.mulf %15, %17 : vector<2x256xf32>
    %19 = arith.addf %14, %18 : vector<2x256xf32>
    %c49_i32 = arith.constant 49 : i32
    %20 = tpu.dynamic_rotate %8 by %c49_i32 dim 1 : vector<2x256xf32>, i32 -> vector<2x256xf32>
    %c2 = arith.constant 2 : index
    %c0_10 = arith.constant 0 : index
    %c0_11 = arith.constant 0 : index
    %21 = vector.load %arg2[%c2, %c0_10, %c0_11] : memref<49x2x256xf32, #tpu.memory_space<vmem>>, vector<1x2x256xf32>
    %22 = vector.shape_cast %21 : vector<1x2x256xf32> to vector<2x256xf32>
    %23 = arith.mulf %20, %22 : vector<2x256xf32>
    %24 = arith.addf %19, %23 : vector<2x256xf32>
    %c48_i32 = arith.constant 48 : i32
    %25 = tpu.dynamic_rotate %8 by %c48_i32 dim 1 : vector<2x256xf32>, i32 -> vector<2x256xf32>
    %c3 = arith.constant 3 : index
    %c0_12 = arith.constant 0 : index
    %c0_13 = arith.constant 0 : index
    %26 = vector.load %arg2[%c3, %c0_12, %c0_13] : memref<49x2x256xf32, #tpu.memory_space<vmem>>, vector<1x2x256xf32>
    %27 = vector.shape_cast %26 : vector<1x2x256xf32> to vector<2x256xf32>
    %28 = arith.mulf %25, %27 : vector<2x256xf32>
    %29 = arith.addf %24, %28 : vector<2x256xf32>
    %c47_i32 = arith.constant 47 : i32
    %30 = tpu.dynamic_rotate %8 by %c47_i32 dim 1 : vector<2x256xf32>, i32 -> vector<2x256xf32>
    %c4 = arith.constant 4 : index
    %c0_14 = arith.constant 0 : index
    %c0_15 = arith.constant 0 : index
    %31 = vector.load %arg2[%c4, %c0_14, %c0_15] : memref<49x2x256xf32, #tpu.memory_space<vmem>>, vector<1x2x256xf32>
    %32 = vector.shape_cast %31 : vector<1x2x256xf32> to vector<2x256xf32>
    %33 = arith.mulf %30, %32 : vector<2x256xf32>
    %34 = arith.addf %29, %33 : vector<2x256xf32>
    %c46_i32 = arith.constant 46 : i32
    %35 = tpu.dynamic_rotate %8 by %c46_i32 dim 1 : vector<2x256xf32>, i32 -> vector<2x256xf32>
    %c5 = arith.constant 5 : index
    %c0_16 = arith.constant 0 : index
    %c0_17 = arith.constant 0 : index
    %36 = vector.load %arg2[%c5, %c0_16, %c0_17] : memref<49x2x256xf32, #tpu.memory_space<vmem>>, vector<1x2x256xf32>
    %37 = vector.shape_cast %36 : vector<1x2x256xf32> to vector<2x256xf32>
    %38 = arith.mulf %35, %37 : vector<2x256xf32>
    %39 = arith.addf %34, %38 : vector<2x256xf32>
    %c45_i32 = arith.constant 45 : i32
    %40 = tpu.dynamic_rotate %8 by %c45_i32 dim 1 : vector<2x256xf32>, i32 -> vector<2x256xf32>
    %c6 = arith.constant 6 : index
    %c0_18 = arith.constant 0 : index
    %c0_19 = arith.constant 0 : index
    %41 = vector.load %arg2[%c6, %c0_18, %c0_19] : memref<49x2x256xf32, #tpu.memory_space<vmem>>, vector<1x2x256xf32>
    %42 = vector.shape_cast %41 : vector<1x2x256xf32> to vector<2x256xf32>
    %43 = arith.mulf %40, %42 : vector<2x256xf32>
    %44 = arith.addf %39, %43 : vector<2x256xf32>
    %c35_i32 = arith.constant 35 : i32
    %45 = tpu.dynamic_rotate %8 by %c35_i32 dim 1 : vector<2x256xf32>, i32 -> vector<2x256xf32>
    %c7 = arith.constant 7 : index
    %c0_20 = arith.constant 0 : index
    %c0_21 = arith.constant 0 : index
    %46 = vector.load %arg2[%c7, %c0_20, %c0_21] : memref<49x2x256xf32, #tpu.memory_space<vmem>>, vector<1x2x256xf32>
    %47 = vector.shape_cast %46 : vector<1x2x256xf32> to vector<2x256xf32>
    %48 = arith.mulf %45, %47 : vector<2x256xf32>
    %49 = arith.addf %44, %48 : vector<2x256xf32>
    %c34_i32 = arith.constant 34 : i32
    %50 = tpu.dynamic_rotate %8 by %c34_i32 dim 1 : vector<2x256xf32>, i32 -> vector<2x256xf32>
    %c8 = arith.constant 8 : index
    %c0_22 = arith.constant 0 : index
    %c0_23 = arith.constant 0 : index
    %51 = vector.load %arg2[%c8, %c0_22, %c0_23] : memref<49x2x256xf32, #tpu.memory_space<vmem>>, vector<1x2x256xf32>
    %52 = vector.shape_cast %51 : vector<1x2x256xf32> to vector<2x256xf32>
    %53 = arith.mulf %50, %52 : vector<2x256xf32>
    %54 = arith.addf %49, %53 : vector<2x256xf32>
    %c33_i32 = arith.constant 33 : i32
    %55 = tpu.dynamic_rotate %8 by %c33_i32 dim 1 : vector<2x256xf32>, i32 -> vector<2x256xf32>
    %c9 = arith.constant 9 : index
    %c0_24 = arith.constant 0 : index
    %c0_25 = arith.constant 0 : index
    %56 = vector.load %arg2[%c9, %c0_24, %c0_25] : memref<49x2x256xf32, #tpu.memory_space<vmem>>, vector<1x2x256xf32>
    %57 = vector.shape_cast %56 : vector<1x2x256xf32> to vector<2x256xf32>
    %58 = arith.mulf %55, %57 : vector<2x256xf32>
    %59 = arith.addf %54, %58 : vector<2x256xf32>
    %c32_i32 = arith.constant 32 : i32
    %60 = tpu.dynamic_rotate %8 by %c32_i32 dim 1 : vector<2x256xf32>, i32 -> vector<2x256xf32>
    %c10 = arith.constant 10 : index
    %c0_26 = arith.constant 0 : index
    %c0_27 = arith.constant 0 : index
    %61 = vector.load %arg2[%c10, %c0_26, %c0_27] : memref<49x2x256xf32, #tpu.memory_space<vmem>>, vector<1x2x256xf32>
    %62 = vector.shape_cast %61 : vector<1x2x256xf32> to vector<2x256xf32>
    %63 = arith.mulf %60, %62 : vector<2x256xf32>
    %64 = arith.addf %59, %63 : vector<2x256xf32>
    %c31_i32 = arith.constant 31 : i32
    %65 = tpu.dynamic_rotate %8 by %c31_i32 dim 1 : vector<2x256xf32>, i32 -> vector<2x256xf32>
    %c11 = arith.constant 11 : index
    %c0_28 = arith.constant 0 : index
    %c0_29 = arith.constant 0 : index
    %66 = vector.load %arg2[%c11, %c0_28, %c0_29] : memref<49x2x256xf32, #tpu.memory_space<vmem>>, vector<1x2x256xf32>
    %67 = vector.shape_cast %66 : vector<1x2x256xf32> to vector<2x256xf32>
    %68 = arith.mulf %65, %67 : vector<2x256xf32>
    %69 = arith.addf %64, %68 : vector<2x256xf32>
    %c30_i32 = arith.constant 30 : i32
    %70 = tpu.dynamic_rotate %8 by %c30_i32 dim 1 : vector<2x256xf32>, i32 -> vector<2x256xf32>
    %c12 = arith.constant 12 : index
    %c0_30 = arith.constant 0 : index
    %c0_31 = arith.constant 0 : index
    %71 = vector.load %arg2[%c12, %c0_30, %c0_31] : memref<49x2x256xf32, #tpu.memory_space<vmem>>, vector<1x2x256xf32>
    %72 = vector.shape_cast %71 : vector<1x2x256xf32> to vector<2x256xf32>
    %73 = arith.mulf %70, %72 : vector<2x256xf32>
    %74 = arith.addf %69, %73 : vector<2x256xf32>
    %c29_i32 = arith.constant 29 : i32
    %75 = tpu.dynamic_rotate %8 by %c29_i32 dim 1 : vector<2x256xf32>, i32 -> vector<2x256xf32>
    %c13 = arith.constant 13 : index
    %c0_32 = arith.constant 0 : index
    %c0_33 = arith.constant 0 : index
    %76 = vector.load %arg2[%c13, %c0_32, %c0_33] : memref<49x2x256xf32, #tpu.memory_space<vmem>>, vector<1x2x256xf32>
    %77 = vector.shape_cast %76 : vector<1x2x256xf32> to vector<2x256xf32>
    %78 = arith.mulf %75, %77 : vector<2x256xf32>
    %79 = arith.addf %74, %78 : vector<2x256xf32>
    %c19_i32 = arith.constant 19 : i32
    %80 = tpu.dynamic_rotate %8 by %c19_i32 dim 1 : vector<2x256xf32>, i32 -> vector<2x256xf32>
    %c14 = arith.constant 14 : index
    %c0_34 = arith.constant 0 : index
    %c0_35 = arith.constant 0 : index
    %81 = vector.load %arg2[%c14, %c0_34, %c0_35] : memref<49x2x256xf32, #tpu.memory_space<vmem>>, vector<1x2x256xf32>
    %82 = vector.shape_cast %81 : vector<1x2x256xf32> to vector<2x256xf32>
    %83 = arith.mulf %80, %82 : vector<2x256xf32>
    %84 = arith.addf %79, %83 : vector<2x256xf32>
    %c18_i32 = arith.constant 18 : i32
    %85 = tpu.dynamic_rotate %8 by %c18_i32 dim 1 : vector<2x256xf32>, i32 -> vector<2x256xf32>
    %c15 = arith.constant 15 : index
    %c0_36 = arith.constant 0 : index
    %c0_37 = arith.constant 0 : index
    %86 = vector.load %arg2[%c15, %c0_36, %c0_37] : memref<49x2x256xf32, #tpu.memory_space<vmem>>, vector<1x2x256xf32>
    %87 = vector.shape_cast %86 : vector<1x2x256xf32> to vector<2x256xf32>
    %88 = arith.mulf %85, %87 : vector<2x256xf32>
    %89 = arith.addf %84, %88 : vector<2x256xf32>
    %c17_i32 = arith.constant 17 : i32
    %90 = tpu.dynamic_rotate %8 by %c17_i32 dim 1 : vector<2x256xf32>, i32 -> vector<2x256xf32>
    %c16 = arith.constant 16 : index
    %c0_38 = arith.constant 0 : index
    %c0_39 = arith.constant 0 : index
    %91 = vector.load %arg2[%c16, %c0_38, %c0_39] : memref<49x2x256xf32, #tpu.memory_space<vmem>>, vector<1x2x256xf32>
    %92 = vector.shape_cast %91 : vector<1x2x256xf32> to vector<2x256xf32>
    %93 = arith.mulf %90, %92 : vector<2x256xf32>
    %94 = arith.addf %89, %93 : vector<2x256xf32>
    %c16_i32 = arith.constant 16 : i32
    %95 = tpu.dynamic_rotate %8 by %c16_i32 dim 1 : vector<2x256xf32>, i32 -> vector<2x256xf32>
    %c17 = arith.constant 17 : index
    %c0_40 = arith.constant 0 : index
    %c0_41 = arith.constant 0 : index
    %96 = vector.load %arg2[%c17, %c0_40, %c0_41] : memref<49x2x256xf32, #tpu.memory_space<vmem>>, vector<1x2x256xf32>
    %97 = vector.shape_cast %96 : vector<1x2x256xf32> to vector<2x256xf32>
    %98 = arith.mulf %95, %97 : vector<2x256xf32>
    %99 = arith.addf %94, %98 : vector<2x256xf32>
    %c15_i32 = arith.constant 15 : i32
    %100 = tpu.dynamic_rotate %8 by %c15_i32 dim 1 : vector<2x256xf32>, i32 -> vector<2x256xf32>
    %c18 = arith.constant 18 : index
    %c0_42 = arith.constant 0 : index
    %c0_43 = arith.constant 0 : index
    %101 = vector.load %arg2[%c18, %c0_42, %c0_43] : memref<49x2x256xf32, #tpu.memory_space<vmem>>, vector<1x2x256xf32>
    %102 = vector.shape_cast %101 : vector<1x2x256xf32> to vector<2x256xf32>
    %103 = arith.mulf %100, %102 : vector<2x256xf32>
    %104 = arith.addf %99, %103 : vector<2x256xf32>
    %c14_i32 = arith.constant 14 : i32
    %105 = tpu.dynamic_rotate %8 by %c14_i32 dim 1 : vector<2x256xf32>, i32 -> vector<2x256xf32>
    %c19 = arith.constant 19 : index
    %c0_44 = arith.constant 0 : index
    %c0_45 = arith.constant 0 : index
    %106 = vector.load %arg2[%c19, %c0_44, %c0_45] : memref<49x2x256xf32, #tpu.memory_space<vmem>>, vector<1x2x256xf32>
    %107 = vector.shape_cast %106 : vector<1x2x256xf32> to vector<2x256xf32>
    %108 = arith.mulf %105, %107 : vector<2x256xf32>
    %109 = arith.addf %104, %108 : vector<2x256xf32>
    %c13_i32 = arith.constant 13 : i32
    %110 = tpu.dynamic_rotate %8 by %c13_i32 dim 1 : vector<2x256xf32>, i32 -> vector<2x256xf32>
    %c20 = arith.constant 20 : index
    %c0_46 = arith.constant 0 : index
    %c0_47 = arith.constant 0 : index
    %111 = vector.load %arg2[%c20, %c0_46, %c0_47] : memref<49x2x256xf32, #tpu.memory_space<vmem>>, vector<1x2x256xf32>
    %112 = vector.shape_cast %111 : vector<1x2x256xf32> to vector<2x256xf32>
    %113 = arith.mulf %110, %112 : vector<2x256xf32>
    %114 = arith.addf %109, %113 : vector<2x256xf32>
    %c3_i32 = arith.constant 3 : i32
    %115 = tpu.dynamic_rotate %8 by %c3_i32 dim 1 : vector<2x256xf32>, i32 -> vector<2x256xf32>
    %c21 = arith.constant 21 : index
    %c0_48 = arith.constant 0 : index
    %c0_49 = arith.constant 0 : index
    %116 = vector.load %arg2[%c21, %c0_48, %c0_49] : memref<49x2x256xf32, #tpu.memory_space<vmem>>, vector<1x2x256xf32>
    %117 = vector.shape_cast %116 : vector<1x2x256xf32> to vector<2x256xf32>
    %118 = arith.mulf %115, %117 : vector<2x256xf32>
    %119 = arith.addf %114, %118 : vector<2x256xf32>
    %c2_i32 = arith.constant 2 : i32
    %120 = tpu.dynamic_rotate %8 by %c2_i32 dim 1 : vector<2x256xf32>, i32 -> vector<2x256xf32>
    %c22 = arith.constant 22 : index
    %c0_50 = arith.constant 0 : index
    %c0_51 = arith.constant 0 : index
    %121 = vector.load %arg2[%c22, %c0_50, %c0_51] : memref<49x2x256xf32, #tpu.memory_space<vmem>>, vector<1x2x256xf32>
    %122 = vector.shape_cast %121 : vector<1x2x256xf32> to vector<2x256xf32>
    %123 = arith.mulf %120, %122 : vector<2x256xf32>
    %124 = arith.addf %119, %123 : vector<2x256xf32>
    %c1_i32 = arith.constant 1 : i32
    %125 = tpu.dynamic_rotate %8 by %c1_i32 dim 1 : vector<2x256xf32>, i32 -> vector<2x256xf32>
    %c23 = arith.constant 23 : index
    %c0_52 = arith.constant 0 : index
    %c0_53 = arith.constant 0 : index
    %126 = vector.load %arg2[%c23, %c0_52, %c0_53] : memref<49x2x256xf32, #tpu.memory_space<vmem>>, vector<1x2x256xf32>
    %127 = vector.shape_cast %126 : vector<1x2x256xf32> to vector<2x256xf32>
    %128 = arith.mulf %125, %127 : vector<2x256xf32>
    %129 = arith.addf %124, %128 : vector<2x256xf32>
    %c24 = arith.constant 24 : index
    %c0_54 = arith.constant 0 : index
    %c0_55 = arith.constant 0 : index
    %130 = vector.load %arg2[%c24, %c0_54, %c0_55] : memref<49x2x256xf32, #tpu.memory_space<vmem>>, vector<1x2x256xf32>
    %131 = vector.shape_cast %130 : vector<1x2x256xf32> to vector<2x256xf32>
    %132 = arith.mulf %8, %131 : vector<2x256xf32>
    %133 = arith.addf %129, %132 : vector<2x256xf32>
    %c255_i32 = arith.constant 255 : i32
    %134 = tpu.dynamic_rotate %8 by %c255_i32 dim 1 : vector<2x256xf32>, i32 -> vector<2x256xf32>
    %c25 = arith.constant 25 : index
    %c0_56 = arith.constant 0 : index
    %c0_57 = arith.constant 0 : index
    %135 = vector.load %arg2[%c25, %c0_56, %c0_57] : memref<49x2x256xf32, #tpu.memory_space<vmem>>, vector<1x2x256xf32>
    %136 = vector.shape_cast %135 : vector<1x2x256xf32> to vector<2x256xf32>
    %137 = arith.mulf %134, %136 : vector<2x256xf32>
    %138 = arith.addf %133, %137 : vector<2x256xf32>
    %c254_i32 = arith.constant 254 : i32
    %139 = tpu.dynamic_rotate %8 by %c254_i32 dim 1 : vector<2x256xf32>, i32 -> vector<2x256xf32>
    %c26 = arith.constant 26 : index
    %c0_58 = arith.constant 0 : index
    %c0_59 = arith.constant 0 : index
    %140 = vector.load %arg2[%c26, %c0_58, %c0_59] : memref<49x2x256xf32, #tpu.memory_space<vmem>>, vector<1x2x256xf32>
    %141 = vector.shape_cast %140 : vector<1x2x256xf32> to vector<2x256xf32>
    %142 = arith.mulf %139, %141 : vector<2x256xf32>
    %143 = arith.addf %138, %142 : vector<2x256xf32>
    %c253_i32 = arith.constant 253 : i32
    %144 = tpu.dynamic_rotate %8 by %c253_i32 dim 1 : vector<2x256xf32>, i32 -> vector<2x256xf32>
    %c27 = arith.constant 27 : index
    %c0_60 = arith.constant 0 : index
    %c0_61 = arith.constant 0 : index
    %145 = vector.load %arg2[%c27, %c0_60, %c0_61] : memref<49x2x256xf32, #tpu.memory_space<vmem>>, vector<1x2x256xf32>
    %146 = vector.shape_cast %145 : vector<1x2x256xf32> to vector<2x256xf32>
    %147 = arith.mulf %144, %146 : vector<2x256xf32>
    %148 = arith.addf %143, %147 : vector<2x256xf32>
    %c243_i32 = arith.constant 243 : i32
    %149 = tpu.dynamic_rotate %8 by %c243_i32 dim 1 : vector<2x256xf32>, i32 -> vector<2x256xf32>
    %c28 = arith.constant 28 : index
    %c0_62 = arith.constant 0 : index
    %c0_63 = arith.constant 0 : index
    %150 = vector.load %arg2[%c28, %c0_62, %c0_63] : memref<49x2x256xf32, #tpu.memory_space<vmem>>, vector<1x2x256xf32>
    %151 = vector.shape_cast %150 : vector<1x2x256xf32> to vector<2x256xf32>
    %152 = arith.mulf %149, %151 : vector<2x256xf32>
    %153 = arith.addf %148, %152 : vector<2x256xf32>
    %c242_i32 = arith.constant 242 : i32
    %154 = tpu.dynamic_rotate %8 by %c242_i32 dim 1 : vector<2x256xf32>, i32 -> vector<2x256xf32>
    %c29 = arith.constant 29 : index
    %c0_64 = arith.constant 0 : index
    %c0_65 = arith.constant 0 : index
    %155 = vector.load %arg2[%c29, %c0_64, %c0_65] : memref<49x2x256xf32, #tpu.memory_space<vmem>>, vector<1x2x256xf32>
    %156 = vector.shape_cast %155 : vector<1x2x256xf32> to vector<2x256xf32>
    %157 = arith.mulf %154, %156 : vector<2x256xf32>
    %158 = arith.addf %153, %157 : vector<2x256xf32>
    %c241_i32 = arith.constant 241 : i32
    %159 = tpu.dynamic_rotate %8 by %c241_i32 dim 1 : vector<2x256xf32>, i32 -> vector<2x256xf32>
    %c30 = arith.constant 30 : index
    %c0_66 = arith.constant 0 : index
    %c0_67 = arith.constant 0 : index
    %160 = vector.load %arg2[%c30, %c0_66, %c0_67] : memref<49x2x256xf32, #tpu.memory_space<vmem>>, vector<1x2x256xf32>
    %161 = vector.shape_cast %160 : vector<1x2x256xf32> to vector<2x256xf32>
    %162 = arith.mulf %159, %161 : vector<2x256xf32>
    %163 = arith.addf %158, %162 : vector<2x256xf32>
    %c240_i32 = arith.constant 240 : i32
    %164 = tpu.dynamic_rotate %8 by %c240_i32 dim 1 : vector<2x256xf32>, i32 -> vector<2x256xf32>
    %c31 = arith.constant 31 : index
    %c0_68 = arith.constant 0 : index
    %c0_69 = arith.constant 0 : index
    %165 = vector.load %arg2[%c31, %c0_68, %c0_69] : memref<49x2x256xf32, #tpu.memory_space<vmem>>, vector<1x2x256xf32>
    %166 = vector.shape_cast %165 : vector<1x2x256xf32> to vector<2x256xf32>
    %167 = arith.mulf %164, %166 : vector<2x256xf32>
    %168 = arith.addf %163, %167 : vector<2x256xf32>
    %c239_i32 = arith.constant 239 : i32
    %169 = tpu.dynamic_rotate %8 by %c239_i32 dim 1 : vector<2x256xf32>, i32 -> vector<2x256xf32>
    %c32 = arith.constant 32 : index
    %c0_70 = arith.constant 0 : index
    %c0_71 = arith.constant 0 : index
    %170 = vector.load %arg2[%c32, %c0_70, %c0_71] : memref<49x2x256xf32, #tpu.memory_space<vmem>>, vector<1x2x256xf32>
    %171 = vector.shape_cast %170 : vector<1x2x256xf32> to vector<2x256xf32>
    %172 = arith.mulf %169, %171 : vector<2x256xf32>
    %173 = arith.addf %168, %172 : vector<2x256xf32>
    %c238_i32 = arith.constant 238 : i32
    %174 = tpu.dynamic_rotate %8 by %c238_i32 dim 1 : vector<2x256xf32>, i32 -> vector<2x256xf32>
    %c33 = arith.constant 33 : index
    %c0_72 = arith.constant 0 : index
    %c0_73 = arith.constant 0 : index
    %175 = vector.load %arg2[%c33, %c0_72, %c0_73] : memref<49x2x256xf32, #tpu.memory_space<vmem>>, vector<1x2x256xf32>
    %176 = vector.shape_cast %175 : vector<1x2x256xf32> to vector<2x256xf32>
    %177 = arith.mulf %174, %176 : vector<2x256xf32>
    %178 = arith.addf %173, %177 : vector<2x256xf32>
    %c237_i32 = arith.constant 237 : i32
    %179 = tpu.dynamic_rotate %8 by %c237_i32 dim 1 : vector<2x256xf32>, i32 -> vector<2x256xf32>
    %c34 = arith.constant 34 : index
    %c0_74 = arith.constant 0 : index
    %c0_75 = arith.constant 0 : index
    %180 = vector.load %arg2[%c34, %c0_74, %c0_75] : memref<49x2x256xf32, #tpu.memory_space<vmem>>, vector<1x2x256xf32>
    %181 = vector.shape_cast %180 : vector<1x2x256xf32> to vector<2x256xf32>
    %182 = arith.mulf %179, %181 : vector<2x256xf32>
    %183 = arith.addf %178, %182 : vector<2x256xf32>
    %c227_i32 = arith.constant 227 : i32
    %184 = tpu.dynamic_rotate %8 by %c227_i32 dim 1 : vector<2x256xf32>, i32 -> vector<2x256xf32>
    %c35 = arith.constant 35 : index
    %c0_76 = arith.constant 0 : index
    %c0_77 = arith.constant 0 : index
    %185 = vector.load %arg2[%c35, %c0_76, %c0_77] : memref<49x2x256xf32, #tpu.memory_space<vmem>>, vector<1x2x256xf32>
    %186 = vector.shape_cast %185 : vector<1x2x256xf32> to vector<2x256xf32>
    %187 = arith.mulf %184, %186 : vector<2x256xf32>
    %188 = arith.addf %183, %187 : vector<2x256xf32>
    %c226_i32 = arith.constant 226 : i32
    %189 = tpu.dynamic_rotate %8 by %c226_i32 dim 1 : vector<2x256xf32>, i32 -> vector<2x256xf32>
    %c36 = arith.constant 36 : index
    %c0_78 = arith.constant 0 : index
    %c0_79 = arith.constant 0 : index
    %190 = vector.load %arg2[%c36, %c0_78, %c0_79] : memref<49x2x256xf32, #tpu.memory_space<vmem>>, vector<1x2x256xf32>
    %191 = vector.shape_cast %190 : vector<1x2x256xf32> to vector<2x256xf32>
    %192 = arith.mulf %189, %191 : vector<2x256xf32>
    %193 = arith.addf %188, %192 : vector<2x256xf32>
    %c225_i32 = arith.constant 225 : i32
    %194 = tpu.dynamic_rotate %8 by %c225_i32 dim 1 : vector<2x256xf32>, i32 -> vector<2x256xf32>
    %c37 = arith.constant 37 : index
    %c0_80 = arith.constant 0 : index
    %c0_81 = arith.constant 0 : index
    %195 = vector.load %arg2[%c37, %c0_80, %c0_81] : memref<49x2x256xf32, #tpu.memory_space<vmem>>, vector<1x2x256xf32>
    %196 = vector.shape_cast %195 : vector<1x2x256xf32> to vector<2x256xf32>
    %197 = arith.mulf %194, %196 : vector<2x256xf32>
    %198 = arith.addf %193, %197 : vector<2x256xf32>
    %c224_i32 = arith.constant 224 : i32
    %199 = tpu.dynamic_rotate %8 by %c224_i32 dim 1 : vector<2x256xf32>, i32 -> vector<2x256xf32>
    %c38 = arith.constant 38 : index
    %c0_82 = arith.constant 0 : index
    %c0_83 = arith.constant 0 : index
    %200 = vector.load %arg2[%c38, %c0_82, %c0_83] : memref<49x2x256xf32, #tpu.memory_space<vmem>>, vector<1x2x256xf32>
    %201 = vector.shape_cast %200 : vector<1x2x256xf32> to vector<2x256xf32>
    %202 = arith.mulf %199, %201 : vector<2x256xf32>
    %203 = arith.addf %198, %202 : vector<2x256xf32>
    %c223_i32 = arith.constant 223 : i32
    %204 = tpu.dynamic_rotate %8 by %c223_i32 dim 1 : vector<2x256xf32>, i32 -> vector<2x256xf32>
    %c39 = arith.constant 39 : index
    %c0_84 = arith.constant 0 : index
    %c0_85 = arith.constant 0 : index
    %205 = vector.load %arg2[%c39, %c0_84, %c0_85] : memref<49x2x256xf32, #tpu.memory_space<vmem>>, vector<1x2x256xf32>
    %206 = vector.shape_cast %205 : vector<1x2x256xf32> to vector<2x256xf32>
    %207 = arith.mulf %204, %206 : vector<2x256xf32>
    %208 = arith.addf %203, %207 : vector<2x256xf32>
    %c222_i32 = arith.constant 222 : i32
    %209 = tpu.dynamic_rotate %8 by %c222_i32 dim 1 : vector<2x256xf32>, i32 -> vector<2x256xf32>
    %c40 = arith.constant 40 : index
    %c0_86 = arith.constant 0 : index
    %c0_87 = arith.constant 0 : index
    %210 = vector.load %arg2[%c40, %c0_86, %c0_87] : memref<49x2x256xf32, #tpu.memory_space<vmem>>, vector<1x2x256xf32>
    %211 = vector.shape_cast %210 : vector<1x2x256xf32> to vector<2x256xf32>
    %212 = arith.mulf %209, %211 : vector<2x256xf32>
    %213 = arith.addf %208, %212 : vector<2x256xf32>
    %c221_i32 = arith.constant 221 : i32
    %214 = tpu.dynamic_rotate %8 by %c221_i32 dim 1 : vector<2x256xf32>, i32 -> vector<2x256xf32>
    %c41 = arith.constant 41 : index
    %c0_88 = arith.constant 0 : index
    %c0_89 = arith.constant 0 : index
    %215 = vector.load %arg2[%c41, %c0_88, %c0_89] : memref<49x2x256xf32, #tpu.memory_space<vmem>>, vector<1x2x256xf32>
    %216 = vector.shape_cast %215 : vector<1x2x256xf32> to vector<2x256xf32>
    %217 = arith.mulf %214, %216 : vector<2x256xf32>
    %218 = arith.addf %213, %217 : vector<2x256xf32>
    %c211_i32 = arith.constant 211 : i32
    %219 = tpu.dynamic_rotate %8 by %c211_i32 dim 1 : vector<2x256xf32>, i32 -> vector<2x256xf32>
    %c42 = arith.constant 42 : index
    %c0_90 = arith.constant 0 : index
    %c0_91 = arith.constant 0 : index
    %220 = vector.load %arg2[%c42, %c0_90, %c0_91] : memref<49x2x256xf32, #tpu.memory_space<vmem>>, vector<1x2x256xf32>
    %221 = vector.shape_cast %220 : vector<1x2x256xf32> to vector<2x256xf32>
    %222 = arith.mulf %219, %221 : vector<2x256xf32>
    %223 = arith.addf %218, %222 : vector<2x256xf32>
    %c210_i32 = arith.constant 210 : i32
    %224 = tpu.dynamic_rotate %8 by %c210_i32 dim 1 : vector<2x256xf32>, i32 -> vector<2x256xf32>
    %c43 = arith.constant 43 : index
    %c0_92 = arith.constant 0 : index
    %c0_93 = arith.constant 0 : index
    %225 = vector.load %arg2[%c43, %c0_92, %c0_93] : memref<49x2x256xf32, #tpu.memory_space<vmem>>, vector<1x2x256xf32>
    %226 = vector.shape_cast %225 : vector<1x2x256xf32> to vector<2x256xf32>
    %227 = arith.mulf %224, %226 : vector<2x256xf32>
    %228 = arith.addf %223, %227 : vector<2x256xf32>
    %c209_i32 = arith.constant 209 : i32
    %229 = tpu.dynamic_rotate %8 by %c209_i32 dim 1 : vector<2x256xf32>, i32 -> vector<2x256xf32>
    %c44 = arith.constant 44 : index
    %c0_94 = arith.constant 0 : index
    %c0_95 = arith.constant 0 : index
    %230 = vector.load %arg2[%c44, %c0_94, %c0_95] : memref<49x2x256xf32, #tpu.memory_space<vmem>>, vector<1x2x256xf32>
    %231 = vector.shape_cast %230 : vector<1x2x256xf32> to vector<2x256xf32>
    %232 = arith.mulf %229, %231 : vector<2x256xf32>
    %233 = arith.addf %228, %232 : vector<2x256xf32>
    %c208_i32 = arith.constant 208 : i32
    %234 = tpu.dynamic_rotate %8 by %c208_i32 dim 1 : vector<2x256xf32>, i32 -> vector<2x256xf32>
    %c45 = arith.constant 45 : index
    %c0_96 = arith.constant 0 : index
    %c0_97 = arith.constant 0 : index
    %235 = vector.load %arg2[%c45, %c0_96, %c0_97] : memref<49x2x256xf32, #tpu.memory_space<vmem>>, vector<1x2x256xf32>
    %236 = vector.shape_cast %235 : vector<1x2x256xf32> to vector<2x256xf32>
    %237 = arith.mulf %234, %236 : vector<2x256xf32>
    %238 = arith.addf %233, %237 : vector<2x256xf32>
    %c207_i32 = arith.constant 207 : i32
    %239 = tpu.dynamic_rotate %8 by %c207_i32 dim 1 : vector<2x256xf32>, i32 -> vector<2x256xf32>
    %c46 = arith.constant 46 : index
    %c0_98 = arith.constant 0 : index
    %c0_99 = arith.constant 0 : index
    %240 = vector.load %arg2[%c46, %c0_98, %c0_99] : memref<49x2x256xf32, #tpu.memory_space<vmem>>, vector<1x2x256xf32>
    %241 = vector.shape_cast %240 : vector<1x2x256xf32> to vector<2x256xf32>
    %242 = arith.mulf %239, %241 : vector<2x256xf32>
    %243 = arith.addf %238, %242 : vector<2x256xf32>
    %c206_i32 = arith.constant 206 : i32
    %244 = tpu.dynamic_rotate %8 by %c206_i32 dim 1 : vector<2x256xf32>, i32 -> vector<2x256xf32>
    %c47 = arith.constant 47 : index
    %c0_100 = arith.constant 0 : index
    %c0_101 = arith.constant 0 : index
    %245 = vector.load %arg2[%c47, %c0_100, %c0_101] : memref<49x2x256xf32, #tpu.memory_space<vmem>>, vector<1x2x256xf32>
    %246 = vector.shape_cast %245 : vector<1x2x256xf32> to vector<2x256xf32>
    %247 = arith.mulf %244, %246 : vector<2x256xf32>
    %248 = arith.addf %243, %247 : vector<2x256xf32>
    %c205_i32 = arith.constant 205 : i32
    %249 = tpu.dynamic_rotate %8 by %c205_i32 dim 1 : vector<2x256xf32>, i32 -> vector<2x256xf32>
    %c48 = arith.constant 48 : index
    %c0_102 = arith.constant 0 : index
    %c0_103 = arith.constant 0 : index
    %250 = vector.load %arg2[%c48, %c0_102, %c0_103] : memref<49x2x256xf32, #tpu.memory_space<vmem>>, vector<1x2x256xf32>
    %251 = vector.shape_cast %250 : vector<1x2x256xf32> to vector<2x256xf32>
    %252 = arith.mulf %249, %251 : vector<2x256xf32>
    %253 = arith.addf %248, %252 : vector<2x256xf32>
    %254 = vector.extract_strided_slice %253 {offsets = [0, 0], sizes = [1, 256], strides = [1, 1]} : vector<2x256xf32> to vector<1x256xf32>
    %255 = vector.extract_strided_slice %253 {offsets = [1, 0], sizes = [1, 256], strides = [1, 1]} : vector<2x256xf32> to vector<1x256xf32>
    %256 = arith.addf %254, %255 : vector<1x256xf32>
    %257 = arith.negf %256 : vector<1x256xf32>
    %258 = math.exp %257 : vector<1x256xf32>
    %cst_104 = arith.constant 1.000000e+00 : f32
    %259 = vector.broadcast %cst_104 : f32 to vector<1x256xf32>
    %260 = arith.addf %259, %258 : vector<1x256xf32>
    %261 = arith.divf %259, %260 : vector<1x256xf32>
    %c0_105 = arith.constant 0 : index
    %c0_106 = arith.constant 0 : index
    %c0_107 = arith.constant 0 : index
    %262 = vector.load %arg3[%c0_105, %c0_106, %c0_107] : memref<1x1x256xf32, #tpu.memory_space<vmem>>, vector<1x1x256xf32>
    %263 = vector.shape_cast %262 : vector<1x1x256xf32> to vector<1x256xf32>
    %264 = vector.shape_cast %261 : vector<1x256xf32> to vector<1x1x256xf32>
    tpu.vector_store %arg3[%c0_105, %c0_106, %c0_107], %264 {strides = array<i32>} : memref<1x1x256xf32, #tpu.memory_space<vmem>>, vector<1x1x256xf32>,
    return
  }
  func.func @transform_0(%arg0: i32) -> (i32, i32, i32) {
    %c0_i32 = arith.constant 0 : i32
    %c0_i32_0 = arith.constant 0 : i32
    %c0_i32_1 = arith.constant 0 : i32
    return %arg0, %c0_i32, %c0_i32_0 : i32, i32, i32
  }
  func.func @transform_1(%arg0: i32) -> (i32, i32, i32) {
    %c0_i32 = arith.constant 0 : i32
    %c0_i32_0 = arith.constant 0 : i32
    %c0_i32_1 = arith.constant 0 : i32
    %c0_i32_2 = arith.constant 0 : i32
    return %c0_i32, %c0_i32_0, %c0_i32_1 : i32, i32, i32
  }
  func.func @transform_2(%arg0: i32) -> (i32, i32, i32) {
    %c0_i32 = arith.constant 0 : i32
    %c0_i32_0 = arith.constant 0 : i32
    %c0_i32_1 = arith.constant 0 : i32
    return %arg0, %c0_i32, %c0_i32_0 : i32, i32, i32
  }
}

</mosaic_0001>

<bundles_post_ra>
// kernel: tpu_custom_call.1
= control target key start
LH: loop header
LB: loop body
LE: loop exit
PB: predicated region body
PF: predicated region fallthrough
CT: control target
= control target key end

     0   :  { %7 = vsyncpa [#allocation3], 0  ;;  %s2484_s0 = inlined_call_operand.hbm [shape: f32[2,4,256], index: 0, kind: input, shape index: {}]   ;;  %s2485_s1 = inlined_call_operand.hbm [shape: f32[49,2,256], index: 1, kind: input, shape index: {}]   ;;  %s2486_s2 = inlined_call_operand.hbm [shape: f32[2,1,256], index: 2, kind: output, shape index: {}]  }
   0x1   :  { %9 = vsyncpa [#allocation3 + $0x1], 0 }
   0x2   :  { %10 = vsyncpa [#allocation6], 0 }
   0x3   :  { %11 = vsyncpa [#allocation4], 0 }
   0x4   :  { %13 = vsyncpa [#allocation4 + $0x1], 0  ;;  %s1900_s9 = smov 0   ;;  %s1902_s10 = smov 0  }
   0x5   :  { %s1904_s11 = smov 0   ;;  %s1906_s12 = smov 0  }
   0x6 LB: > { %s1921_s13 = sadd.s32 4294967295, %s1829_s12   ;;  %s1521_s14 = sadd.s32 4294967294, %s1829_s12   ;;  %s1829_s12 = sphi %s1906_s12, %s2508_s12   ;;  %s1825_s11 = sphi %s1904_s11, %s2507_s11   ;;  %s1821_s10 = sphi %s1902_s10, %s2506_s10   ;;  %s1817_s9 = sphi %s1900_s9, %s2505_s9  }
   0x7   : > { %p39_p0 = scmp.ne.s32.totalorder %s1821_s10, %s1817_s9  ;;  %p2487_p1 = scmp.eq.s32.totalorder %s1921_s13, 0 }
   0x8   : > { %p90_p3 = scmp.eq.s32.totalorder %s1521_s14, 1  ;;  %p1522_p5 = scmp.ge.s32.totalorder %s1829_s12, 1 }
   0x9   : > { %p1930_p4 = por %p2487_p1, %p39_p0  ;;  %p97_p7 = scmp.lt.s32.totalorder %s1829_s12, 3 }
   0xa   : > { %p1935_p6 = por %p90_p3, %p39_p0  ;;  %s1831_s18 = smov [#allocation5]  }
   0xb   : > { %s2491_s15 = scalar_select %p1930_p4, 1, 0 }
   0xc   : > { %s2492_s16 = scalar_select %p1935_p6, 1, 0 }
   0xd   : > { %p1940_p8 = pnand %p1522_p5, %p97_p7  ;;  %s109_s19 = sshll.u32 %s1831_s18, 4  ;;  %s110_s19 = int_to_ptr.vmem [resolvable:$true] %s109_s19 }
   0xe   : > { %s1954_s21 = sadd.s32 1, %s1829_s12   ;;  %s26_s22 = sadd.s32 1, %s1825_s11 }
   0xf   : > { %s2493_s17 = scalar_select %p1940_p8, 1, 0 }
  0x10   : > { %p1598_p9 = pneg %p1940_p8  ;;  %s23_s23 = ssub.s32 %s1829_s12, %s1954_s21 }
  0x11   : > { %s1718_s24 = scalar_lea.vmem %s110_s19, 3136  ;;  %p1726_p5 = scmp.lt.s32.totalorder %s110_s19, %s110_s19 }
  0x12   : > { %p1949_p11 = pnand %p1598_p9, %p2487_p1  ;;  %p1719_p13 = scmp.ne.s32.totalorder %s110_s19, %s1718_s24 }
  0x13   : > { %p1727_p7 = scmp.lt.s32.totalorder %s1718_s24, %s1718_s24 }
  0x14   : > { %p1709_p12 = pneg %p1949_p11 }
  0x15   : > { %p1728_p10 = por %p1727_p7, %p1726_p5 }
  0x16   : > { %p1721_p0 = pnand %p1719_p13, %p1709_p12 }
  0x18   : > { %p1722_p3 = pneg %p1721_p0 }
  0x1a   : > { %p1729_p2 = pnand %p1728_p10, %p1722_p3 }
  0x1c   : > { %1732 = shalt.err (!%p1729_p2)
}
  0x1d   : > { %s1832_s25 = smov 64   ;;  %s1833_s26 = smov 4  }
  0x1e   : > { %1601 = dma.hbm_to_vmem [thread:$0]  (!%p1949_p11), %s2485_s1, 3136, %s110_s19, [#allocation6], %s1832_s25, %s1832_s25, %s1833_s26  }
  0x1f   : > { %p24_p9 = scmp.eq.s32.totalorder %s23_s23, 0  ;;  %p33_p12 = scmp.ne.s32.totalorder %s1825_s11, %s1821_s10 }
  0x20   : > { %p34_p10 = scmp.eq.s32.totalorder %s1829_s12, 0  ;;  %p1611_p2 = scmp.lt.s32.totalorder %s1829_s12, 2 }
  0x21   : > { %s1971_s29 = scalar_select %p24_p9, %s1825_s11, %s26_s22  }
  0x22   : > { %p35_p13 = por %p34_p10, %p33_p12  ;;  %p2495_p0 = scmp.eq.s32.totalorder %s1921_s13, 1 }
  0x23   : > { %s123_s3 = sand.u32 1, %s1825_s11   ;;  %s1588_s4 = sshll.u32 %s1829_s12, 7 }
  0x24   : > { %p1975_p3 = por %p2495_p0, %p33_p12  ;;  %s1525_s5 = sshll.u32 %s123_s3, 3 }
  0x25   : > { %s1984_s8 = scalar_lea.hbm %s2484_s0, %s1588_s4  ;;  %s127_s14 = scalar_lea.vmem [#allocation2], %s1525_s5 }
  0x26   : > { %s2496_s30 = scalar_select %p1975_p3, 1, 0 }
  0x27   : > { %s135_s18 = sshll.u32 %s127_s14, 4  ;;  %p1986_p11 = pnand %p1611_p2, %p35_p13  ;;  %s136_s18 = int_to_ptr.vmem [resolvable:$true] %s135_s18 }
  0x28   : > { %s124_s20 = scalar_lea.sflag [#allocation3], %s123_s3  ;;  %s1733_s22 = scalar_lea.hbm %s1984_s8, 128 }
  0x29   : > { %p1734_p5 = scmp.ne.s32.totalorder %s1984_s8, %s1733_s22  ;;  %p1735_p7 = pneg %p1986_p11 }
  0x2a   : > { %s1738_s25 = scalar_lea.hbm %s2484_s0, 256  ;;  %p1739_p10 = scmp.lt.s32.totalorder %s1984_s8, %s2484_s0 }
  0x2b   : > { %p1736_p9 = pnand %p1735_p7, %p1734_p5  ;;  %p1740_p2 = scmp.lt.s32.totalorder %s1738_s25, %s1733_s22 }
  0x2d   : > { %p1737_p12 = pneg %p1736_p9  ;;  %p1741_p13 = por %p1740_p2, %p1739_p10 }
  0x2f   : > { %p1742_p0 = pnand %p1741_p13, %p1737_p12 }
  0x31   : > { %1745 = shalt.err (!%p1742_p0)
}
  0x32   : > { %s1746_s28 = scalar_lea.vmem %s136_s18, 128  ;;  %s1834_s3 = smov [#allocation2]  }
  0x33   : > { %p1747_p1 = scmp.ne.s32.totalorder %s136_s18, %s1746_s28  ;;  %s1751_s4 = sshll.u32 %s1834_s3, 4  ;;  %s1752_s4 = int_to_ptr.vmem [resolvable:$false] %s1751_s4 }
  0x34   : > { %s1753_s5 = scalar_lea.vmem %s1752_s4, 256  ;;  %p1754_p5 = scmp.lt.s32.totalorder %s136_s18, %s1752_s4 }
  0x35   : > { %p1749_p6 = pnand %p1747_p1, %p1735_p7  ;;  %p1755_p9 = scmp.lt.s32.totalorder %s1753_s5, %s1746_s28 }
  0x37   : > { %p1750_p3 = pneg %p1749_p6  ;;  %p1756_p4 = por %p1755_p9, %p1754_p5 }
  0x39   : > { %p1757_p8 = pnand %p1756_p4, %p1750_p3 }
  0x3b   : > { %1760 = shalt.err (!%p1757_p8)
}
  0x3c   : > { %1605 = dma.hbm_to_vmem [thread:$0]  (!%p1986_p11), %s1984_s8, 128, %s136_s18, %s124_s20  }
  0x3d   : > { %p2498_p12 = scmp.ne.s32.totalorder %s2493_s17, 0 }
  0x3e   : > { %s2007_s6 = sand.u32 (!%p2498_p12), 1, %s1821_s10   ;;  %p2499_p1 = scmp.ne.s32.totalorder (!%p2498_p12), %s2491_s15, 0 }
  0x3f   : > { %144 = sbr.rel (%p2498_p12) target bundleno = 454 (0x1c6), region = 28  ;;  %s1529_s7 = sshll.u32 (!%p2498_p12), %s2007_s6, 3 }
  0x40   : > { %s147_s14 = scalar_lea.sflag (!%p2498_p12), [#allocation3], %s2007_s6  ;;  %s150_s22 = scalar_lea.vmem (!%p2498_p12), [#allocation2], %s1529_s7 }
  0x44   : > { %1804 = dma.done.wait (%p2499_p1), %s147_s14, 128  }
  0x45   : > { %1806 = vsyncadd (%p2499_p1), %s147_s14, 4294967168  ;;  %p2500_p4 = scmp.eq.s32.totalorder %s1921_s13, 0 }
  0x47   : > { %1808 = dma.done.wait (%p2500_p4), [#allocation6], 3136   ;;  %p2501_p6 = pmov %p2500_p4 }
  0x48   : > { %vm179_vm0 = vcmask 1043456   ;;  %v175_v0 = vld [vmem:[%s150_s22] sm:$0xff]  ;;  %vm210_vm1 = vcmask 1040384   ;;  %s1835_s15 = smov 50   ;;  %s1836_s17 = smov 51   ;;  %v217_v34 = vlaneseq }
  0x49   : > { %1810 = vsyncadd (%p2501_p6), [#allocation6], 4294964160  ;;  %v180_v1 = vsel %vm179_vm0, %v175_v0, 0.0  ;;  %v196_v2 = vsel %vm179_vm0, %v175_v0, -inf  ;;  %v177_v3 = vcombine.high %v175_v0, %v175_v0  ;;  %s1837_s8 = smov 49   ;;  %s1838_s18 = smov 48  }
  0x4a   : > { %v181_v4 = vrot.slane %v180_v1, 4  ;;  %v197_v5 = vrot.slane %v196_v2, 4  ;;  %s1839_s19 = smov 47   ;;  %s1840_s20 = smov 46   ;;  %v2082_v35 = vand.u32 127, %v217_v34 }
  0x4b   : > { %v187_v6 = vsel %vm179_vm0, %v177_v3, 0.0  ;;  %v203_v7 = vsel %vm179_vm0, %v177_v3, -inf  ;;  %s1841_s23 = smov 45   ;;  %s1842_s24 = smov 35  }
  0x4c   : > { %v182_v8 = vadd.f32 %v181_v4, %v180_v1  ;;  %v198_v9 = vmax.f32 %v196_v2, %v197_v5  ;;  %v188_v10 = vrot.slane %v187_v6, 4  ;;  %v204_v11 = vrot.slane %v203_v7, 4  ;;  %s1843_s25 = smov 34   ;;  %s1844_s26 = smov 33  }
  0x4d   : > { %s1845_s27 = smov 32   ;;  %s1846_s28 = smov 31   ;;  %vm242_vm2 = vcmp.lt.s32.totalorder %v2082_v35, 50  ;;  %vm266_vm3 = vcmp.lt.s32.totalorder %v2082_v35, 49  ;;  %vm290_vm4 = vcmp.lt.s32.totalorder %v2082_v35, 48  ;;  %vm314_vm5 = vcmp.lt.s32.totalorder %v2082_v35, 47 }
  0x4e   : > { %v183_v12 = vrot.slane %v182_v8, 2  ;;  %v199_v13 = vrot.slane %v198_v9, 2  ;;  %v189_v14 = vadd.f32 %v188_v10, %v187_v6  ;;  %v205_v15 = vmax.f32 %v203_v7, %v204_v11  ;;  %s1847_s3 = smov 30   ;;  %s1848_s4 = smov 29  }
  0x4f   : > { %s1849_s5 = smov 19   ;;  %s1850_s7 = smov 18   ;;  %v1533_v54 = vld.sshfl [vmem:[#allocation5 + $0x4] sm:$0x33 pattern:$0x76325410] }
  0x50   : > { %v184_v16 = vadd.f32 %v183_v12, %v182_v8  ;;  %v200_v17 = vmax.f32 %v198_v9, %v199_v13  ;;  %v190_v18 = vrot.slane %v189_v14, 2  ;;  %v206_v19 = vrot.slane %v205_v15, 2  ;;  %s1851_s14 = smov 17   ;;  %s1852_s22 = smov 16  }
  0x51   : > { %vm338_vm6 = vcmp.lt.s32.totalorder %v2082_v35, 46  ;;  %v1532_v55 = vld.sshfl [vmem:[#allocation5] sm:$0x33 pattern:$0x76325410]  ;;  %v255_v62 = vcombine.high %v1533_v54, %v1533_v54  ;;  %vm362_vm7 = vcmp.lt.s32.totalorder %v2082_v35, 45 }
  0x52   : > { %v185_v20 = vrot.slane %v184_v16, 1  ;;  %v201_v21 = vrot.slane %v200_v17, 1  ;;  %v191_v22 = vadd.f32 %v190_v18, %v189_v14  ;;  %v207_v23 = vmax.f32 %v205_v15, %v206_v19  ;;  %v1534_v56 = vld.sshfl [vmem:[#allocation5 + $0x8] sm:$0x33 pattern:$0x76325410] }
  0x53   : > { %v1535_v59 = vld.sshfl [vmem:[#allocation5 + $0xc] sm:$0x33 pattern:$0x76325410]  ;;  %vm219_vm8 = vcmp.lt.s32.totalorder %v2082_v35, 51  ;;  %v231_v63 = vcombine.high %v1532_v55, %v1532_v55  ;;  %v279_v0 = vcombine.high %v1534_v56, %v1534_v56  ;;  %vm386_vm9 = vcmp.lt.s32.totalorder %v2082_v35, 35 }
  0x54   : > { %v186_v24 = vadd.f32 %v185_v20, %v184_v16  ;;  %v202_v25 = vmax.f32 %v200_v17, %v201_v21  ;;  %v192_v26 = vrot.slane %v191_v22, 1  ;;  %v208_v27 = vrot.slane %v207_v23, 1  ;;  %v1536_v2 = vld.sshfl [vmem:[#allocation5 + $0x10] sm:$0x33 pattern:$0x76325410] }
  0x55   : > { %v303_v1 = vcombine.high %v1535_v59, %v1535_v59  ;;  %v1537_v11 = vld.sshfl [vmem:[#allocation5 + $0x14] sm:$0x33 pattern:$0x76325410]  ;;  %v327_v14 = vcombine.high %v1536_v2, %v1536_v2  ;;  %vm410_vm10 = vcmp.lt.s32.totalorder %v2082_v35, 34  ;;  %vm434_vm11 = vcmp.lt.s32.totalorder %v2082_v35, 33 }
  0x56   : > { %v194_v28 = vmul.f32 0.25, %v186_v24  ;;  %v193_v29 = vadd.f32 %v192_v26, %v191_v22  ;;  %v209_v30 = vmax.f32 %v207_v23, %v208_v27  ;;  %v1538_v17 = vld.sshfl [vmem:[#allocation5 + $0x18] sm:$0x33 pattern:$0x76325410]  ;;  %v351_v22 = vcombine.high %v1537_v11, %v1537_v11  ;;  %p2502_p3 = scmp.ne.s32.totalorder %s2496_s30, 0 }
  0x57   : > { %vm458_vm12 = vcmp.lt.s32.totalorder %v2082_v35, 32  ;;  %vm482_vm13 = vcmp.lt.s32.totalorder %v2082_v35, 31  ;;  %vm506_vm14 = vcmp.lt.s32.totalorder %v2082_v35, 30  ;;  %vm530_vm15 = vcmp.lt.s32.totalorder %v2082_v35, 29 }
  0x58   : > { %v2019_v31 = vsel %vm210_vm1, %v194_v28, %v202_v25  ;;  %v195_v32 = vmul.f32 0.25, %v193_v29  ;;  %v1539_v29 = vld.sshfl [vmem:[#allocation5 + $0x1c] sm:$0x33 pattern:$0x76325410]  ;;  %vm554_vm0 = vcmp.lt.s32.totalorder %v2082_v35, 19 }
  0x59   : > { %238 = vrot.lane.b32.xlu1 %v2019_v31, %s1835_s15  ;;  %213 = vrot.lane.b32.xlu0 %v2019_v31, %s1836_s17 }
  0x5a   : > { %v2023_v33 = vsel %vm210_vm1, %v195_v32, %v209_v30  ;;  %v375_v30 = vcombine.high %v1538_v17, %v1538_v17  ;;  %vm578_vm1 = vcmp.lt.s32.totalorder %v2082_v35, 18 }
  0x5d   : > { %262 = vrot.lane.b32.xlu0 %v2019_v31, %s1837_s8  ;;  %240 = vrot.lane.b32.xlu1 %v2023_v33, %s1835_s15  ;;  %s1853_s15 = smov 15  }
  0x61   : > { %286 = vrot.lane.b32.xlu0 %v2019_v31, %s1838_s18  ;;  %264 = vrot.lane.b32.xlu1 %v2023_v33, %s1837_s8  ;;  %s1855_s8 = smov 13  }
  0x65   : > { %310 = vrot.lane.b32.xlu0 %v2019_v31, %s1839_s19  ;;  %288 = vrot.lane.b32.xlu1 %v2023_v33, %s1838_s18  ;;  %s1856_s18 = smov 3  }
  0x69   : > { %334 = vrot.lane.b32.xlu0 %v2019_v31, %s1840_s20  ;;  %312 = vrot.lane.b32.xlu1 %v2023_v33, %s1839_s19  ;;  %s1857_s19 = smov 2  }
  0x6d   : > { %358 = vrot.lane.b32.xlu0 %v2019_v31, %s1841_s23  ;;  %336 = vrot.lane.b32.xlu1 %v2023_v33, %s1840_s20  ;;  %s1858_s20 = smov 1  }
  0x71   : > { %360 = vrot.lane.b32.xlu1 %v2023_v33, %s1841_s23  ;;  %215 = vrot.lane.b32.xlu0 %v2023_v33, %s1836_s17  ;;  %s1854_s17 = smov 14   ;;  %s1859_s23 = smov 127  }
  0x75   : > { %384 = vrot.lane.b32.xlu1 %v2023_v33, %s1842_s24  ;;  %382 = vrot.lane.b32.xlu0 %v2019_v31, %s1842_s24  ;;  %s1860_s24 = smov 126  }
  0x79   : > { %408 = vrot.lane.b32.xlu1 %v2023_v33, %s1843_s25  ;;  %406 = vrot.lane.b32.xlu0 %v2019_v31, %s1843_s25  ;;  %s1861_s25 = smov 125  }
  0x7d   : > { %432 = vrot.lane.b32.xlu1 %v2023_v33, %s1844_s26  ;;  %430 = vrot.lane.b32.xlu0 %v2019_v31, %s1844_s26  ;;  %s1862_s26 = smov 115  }
  0x81   : > { %456 = vrot.lane.b32.xlu1 %v2023_v33, %s1845_s27  ;;  %454 = vrot.lane.b32.xlu0 %v2019_v31, %s1845_s27  ;;  %s1863_s27 = smov 114  }
  0x85   : > { %480 = vrot.lane.b32.xlu1 %v2023_v33, %s1846_s28  ;;  %478 = vrot.lane.b32.xlu0 %v2019_v31, %s1846_s28  ;;  %s1864_s28 = smov 113  }
  0x89   : > { %504 = vrot.lane.b32.xlu1 %v2023_v33, %s1847_s3  ;;  %502 = vrot.lane.b32.xlu0 %v2019_v31, %s1847_s3  ;;  %s1865_s3 = smov 112  }
  0x8d   : > { %528 = vrot.lane.b32.xlu1 %v2023_v33, %s1848_s4  ;;  %526 = vrot.lane.b32.xlu0 %v2019_v31, %s1848_s4  ;;  %s1866_s4 = smov 111  }
  0x91   : > { %552 = vrot.lane.b32.xlu1 %v2023_v33, %s1849_s5  ;;  %550 = vrot.lane.b32.xlu0 %v2019_v31, %s1849_s5  ;;  %s1867_s5 = smov 110  }
  0x95   : > { %576 = vrot.lane.b32.xlu1 %v2023_v33, %s1850_s7  ;;  %574 = vrot.lane.b32.xlu0 %v2019_v31, %s1850_s7  ;;  %s1868_s7 = smov 109  }
  0x99   : > { %600 = vrot.lane.b32.xlu1 %v2023_v33, %s1851_s14  ;;  %598 = vrot.lane.b32.xlu0 %v2019_v31, %s1851_s14  ;;  %s1869_s14 = smov 99  }
  0x9d   : > { %624 = vrot.lane.b32.xlu1 %v2023_v33, %s1852_s22  ;;  %622 = vrot.lane.b32.xlu0 %v2019_v31, %s1852_s22  ;;  %s1870_s22 = smov 98  }
  0xa1   : > { %648 = vrot.lane.b32.xlu1 %v2023_v33, %s1853_s15  ;;  %646 = vrot.lane.b32.xlu0 %v2019_v31, %s1853_s15  ;;  %s1871_s15 = smov 97  }
  0xa5   : > { %672 = vrot.lane.b32.xlu1 %v2023_v33, %s1854_s17  ;;  %670 = vrot.lane.b32.xlu0 %v2019_v31, %s1854_s17  ;;  %s1872_s17 = smov 96  }
  0xa9   : > { %696 = vrot.lane.b32.xlu1 %v2023_v33, %s1855_s8  ;;  %694 = vrot.lane.b32.xlu0 %v2019_v31, %s1855_s8  ;;  %s1873_s8 = smov 95  }
  0xad   : > { %720 = vrot.lane.b32.xlu1 %v2023_v33, %s1856_s18  ;;  %718 = vrot.lane.b32.xlu0 %v2019_v31, %s1856_s18  ;;  %s1874_s18 = smov 94  }
  0xb1   : > { %744 = vrot.lane.b32.xlu1 %v2023_v33, %s1857_s19  ;;  %742 = vrot.lane.b32.xlu0 %v2019_v31, %s1857_s19  ;;  %s1875_s19 = smov 93  }
  0xb5   : > { %768 = vrot.lane.b32.xlu1 %v2023_v33, %s1858_s20  ;;  %766 = vrot.lane.b32.xlu0 %v2019_v31, %s1858_s20  ;;  %s1876_s20 = smov 83  }
  0xb9   : > { %809 = vrot.lane.b32.xlu1 %v2023_v33, %s1859_s23  ;;  %807 = vrot.lane.b32.xlu0 %v2019_v31, %s1859_s23  ;;  %s1877_s23 = smov 82  }
  0xbd   : > { %833 = vrot.lane.b32.xlu1 %v2023_v33, %s1860_s24  ;;  %831 = vrot.lane.b32.xlu0 %v2019_v31, %s1860_s24  ;;  %s1878_s24 = smov 81  }
  0xc1   : > { %857 = vrot.lane.b32.xlu1 %v2023_v33, %s1861_s25  ;;  %855 = vrot.lane.b32.xlu0 %v2019_v31, %s1861_s25  ;;  %s1879_s25 = smov 80  }
  0xc5   : > { %881 = vrot.lane.b32.xlu1 %v2023_v33, %s1862_s26  ;;  %879 = vrot.lane.b32.xlu0 %v2019_v31, %s1862_s26  ;;  %s1880_s26 = smov 79  }
  0xc9   : > { %905 = vrot.lane.b32.xlu1 %v2023_v33, %s1863_s27  ;;  %903 = vrot.lane.b32.xlu0 %v2019_v31, %s1863_s27  ;;  %s1881_s27 = smov 78  }
  0xcb   : > { %v239_v36 = vpop.permute.xlu1 %238  ;;  %v214_v37 = vpop.permute.xlu0 %213 }
  0xcd   : > { %929 = vrot.lane.b32.xlu1 %v2023_v33, %s1864_s28  ;;  %927 = vrot.lane.b32.xlu0 %v2019_v31, %s1864_s28  ;;  %s1882_s28 = smov 77  }
  0xcf   : > { %v263_v38 = vpop.permute.xlu0 %262  ;;  %v241_v39 = vpop.permute.xlu1 %240 }
  0xd0   : > { %v243_v40 = vsel %vm242_vm2, %v239_v36, %v241_v39  ;;  %v244_v41 = vsel %vm242_vm2, %v241_v39, %v239_v36  ;;  %vm602_vm2 = vcmp.lt.s32.totalorder %v2082_v35, 17 }
  0xd1   : > { %953 = vrot.lane.b32.xlu1 %v2023_v33, %s1865_s3  ;;  %951 = vrot.lane.b32.xlu0 %v2019_v31, %s1865_s3  ;;  %v258_v9 = vmul.f32 %v1533_v54, %v244_v41  ;;  %v259_v10 = vmul.f32 %v255_v62, %v243_v40  ;;  %v1540_v40 = vld.sshfl [vmem:[#allocation5 + $0x20] sm:$0x33 pattern:$0x76325410]  ;;  %s1531_s3 = sshll.u32 %s2007_s6, 1 }
  0xd3   : > { %v287_v42 = vpop.permute.xlu0 %286  ;;  %v265_v43 = vpop.permute.xlu1 %264 }
  0xd4   : > { %v267_v44 = vsel %vm266_vm3, %v263_v38, %v265_v43  ;;  %v268_v45 = vsel %vm266_vm3, %v265_v43, %v263_v38  ;;  %vm626_vm3 = vcmp.lt.s32.totalorder %v2082_v35, 16 }
  0xd5   : > { %977 = vrot.lane.b32.xlu1 %v2023_v33, %s1866_s4  ;;  %975 = vrot.lane.b32.xlu0 %v2019_v31, %s1866_s4  ;;  %v282_v15 = vmul.f32 %v1534_v56, %v268_v45  ;;  %v283_v16 = vmul.f32 %v279_v0, %v267_v44  ;;  %s1589_s4 = sshll.u32 %s1921_s13, 5 }
  0xd7   : > { %v311_v46 = vpop.permute.xlu0 %310  ;;  %v289_v47 = vpop.permute.xlu1 %288 }
  0xd8   : > { %v291_v48 = vsel %vm290_vm4, %v287_v42, %v289_v47  ;;  %v292_v49 = vsel %vm290_vm4, %v289_v47, %v287_v42  ;;  %v399_v42 = vcombine.high %v1539_v29, %v1539_v29  ;;  %vm650_vm4 = vcmp.lt.s32.totalorder %v2082_v35, 15 }
  0xd9   : > { %1001 = vrot.lane.b32.xlu1 %v2023_v33, %s1867_s5  ;;  %999 = vrot.lane.b32.xlu0 %v2019_v31, %s1867_s5  ;;  %v306_v25 = vmul.f32 %v1535_v59, %v292_v49  ;;  %v307_v26 = vmul.f32 %v303_v1, %v291_v48  ;;  %v1541_v49 = vld.sshfl [vmem:[#allocation5 + $0x24] sm:$0x33 pattern:$0x76325410]  ;;  %s174_s5 = scalar_lea.vmem [#allocation7], %s1531_s3 }
  0xda   : > { %v1543_v1 = vld.sshfl [vmem:[#allocation5 + $0x2c] sm:$0x33 pattern:$0x76325410] }
  0xdb   : > { %v335_v50 = vpop.permute.xlu0 %334  ;;  %v313_v51 = vpop.permute.xlu1 %312 }
  0xdc   : > { %v315_v52 = vsel %vm314_vm5, %v311_v46, %v313_v51  ;;  %v316_v53 = vsel %vm314_vm5, %v313_v51, %v311_v46  ;;  %vm674_vm5 = vcmp.lt.s32.totalorder %v2082_v35, 14 }
  0xdd   : > { %1025 = vrot.lane.b32.xlu1 %v2023_v33, %s1868_s7  ;;  %1023 = vrot.lane.b32.xlu0 %v2019_v31, %s1868_s7  ;;  %v330_v32 = vmul.f32 %v1536_v2, %v316_v53  ;;  %v331_v36 = vmul.f32 %v327_v14, %v315_v52  ;;  %s1441_s7 = sshll.u32 %s174_s5, 4  ;;  %s1442_s7 = int_to_ptr.vmem [resolvable:$true] %s1441_s7 }
  0xdf   : > { %v359_v57 = vpop.permute.xlu0 %358  ;;  %v337_v58 = vpop.permute.xlu1 %336 }
  0xe0   : > { %v339_v60 = vsel %vm338_vm6, %v335_v50, %v337_v58  ;;  %v340_v61 = vsel %vm338_vm6, %v337_v58, %v335_v50  ;;  %v423_v50 = vcombine.high %v1540_v40, %v1540_v40  ;;  %v447_v58 = vcombine.high %v1541_v49, %v1541_v49 }
  0xe1   : > { %1049 = vrot.lane.b32.xlu1 %v2023_v33, %s1869_s14  ;;  %1047 = vrot.lane.b32.xlu0 %v2019_v31, %s1869_s14  ;;  %v354_v45 = vmul.f32 %v1537_v11, %v340_v61  ;;  %v355_v46 = vmul.f32 %v351_v22, %v339_v60  ;;  %v495_v11 = vcombine.high %v1543_v1, %v1543_v1  ;;  %vm698_vm6 = vcmp.lt.s32.totalorder %v2082_v35, 13 }
  0xe3   : > { %v361_v3 = vpop.permute.xlu1 %360  ;;  %v216_v4 = vpop.permute.xlu0 %215 }
  0xe4   : > { %v363_v5 = vsel %vm362_vm7, %v359_v57, %v361_v3  ;;  %v364_v6 = vsel %vm362_vm7, %v361_v3, %v359_v57  ;;  %v220_v7 = vsel %vm219_vm8, %v214_v37, %v216_v4  ;;  %v221_v8 = vsel %vm219_vm8, %v216_v4, %v214_v37  ;;  %v1542_v57 = vld.sshfl [vmem:[#allocation5 + $0x28] sm:$0x33 pattern:$0x76325410] }
  0xe5   : > { %v234_v12 = vmul.f32 %v1532_v55, %v221_v8  ;;  %v235_v13 = vmul.f32 %v231_v63, %v220_v7  ;;  %1073 = vrot.lane.b32.xlu1 %v2023_v33, %s1870_s22  ;;  %1071 = vrot.lane.b32.xlu0 %v2019_v31, %s1870_s22  ;;  %v378_v51 = vmul.f32 %v1538_v17, %v364_v6  ;;  %vm722_vm7 = vcmp.lt.s32.totalorder %v2082_v35, 3 }
  0xe6   : > { %v379_v52 = vmul.f32 %v375_v30, %v363_v5  ;;  %v471_v2 = vcombine.high %v1542_v57, %v1542_v57  ;;  %v1545_v30 = vld.sshfl [vmem:[#allocation5 + $0x34] sm:$0x33 pattern:$0x76325410]  ;;  %vm746_vm8 = vcmp.lt.s32.totalorder %v2082_v35, 2 }
  0xe7   : > { %v260_v18 = vadd.f32 %v258_v9, %v234_v12  ;;  %v261_v19 = vadd.f32 %v259_v10, %v235_v13  ;;  %v385_v20 = vpop.permute.xlu1 %384  ;;  %v383_v21 = vpop.permute.xlu0 %382 }
  0xe8   : > { %v387_v23 = vsel %vm386_vm9, %v383_v21, %v385_v20  ;;  %v388_v24 = vsel %vm386_vm9, %v385_v20, %v383_v21  ;;  %vm770_vm9 = vcmp.lt.s32.totalorder %v2082_v35, 1 }
  0xe9   : > { %v284_v27 = vadd.f32 %v282_v15, %v260_v18  ;;  %v285_v28 = vadd.f32 %v283_v16, %v261_v19  ;;  %1097 = vrot.lane.b32.xlu1 %v2023_v33, %s1871_s15  ;;  %1095 = vrot.lane.b32.xlu0 %v2019_v31, %s1871_s15  ;;  %v402_v63 = vmul.f32 %v1539_v29, %v388_v24  ;;  %v1544_v16 = vld.sshfl [vmem:[#allocation5 + $0x30] sm:$0x33 pattern:$0x76325410]  ;;  %s1439_s15 = scalar_lea.hbm %s2486_s2, %s1589_s4 }
  0xea   : > { %v403_v0 = vmul.f32 %v399_v42, %v387_v23 }
  0xeb   : > { %v308_v37 = vadd.f32 %v306_v25, %v284_v27  ;;  %v309_v38 = vadd.f32 %v307_v26, %v285_v28  ;;  %v409_v39 = vpop.permute.xlu1 %408  ;;  %v407_v41 = vpop.permute.xlu0 %406  ;;  %v519_v25 = vcombine.high %v1544_v16, %v1544_v16 }
  0xec   : > { %v411_v43 = vsel %vm410_vm10, %v407_v41, %v409_v39  ;;  %v412_v44 = vsel %vm410_vm10, %v409_v39, %v407_v41  ;;  %vm811_vm10 = vcmp.lt.s32.totalorder %v2082_v35, 127 }
  0xed   : > { %v332_v47 = vadd.f32 %v330_v32, %v308_v37  ;;  %v333_v48 = vadd.f32 %v331_v36, %v309_v38  ;;  %1121 = vrot.lane.b32.xlu1 %v2023_v33, %s1872_s17  ;;  %1119 = vrot.lane.b32.xlu0 %v2019_v31, %s1872_s17  ;;  %v426_v5 = vmul.f32 %v1540_v40, %v412_v44  ;;  %v1546_v44 = vld.sshfl [vmem:[#allocation5 + $0x38] sm:$0x33 pattern:$0x76325410]  ;;  %s1427_s17 = scalar_lea.sflag [#allocation4], %s2007_s6 }
  0xee   : > { %v427_v6 = vmul.f32 %v423_v50, %v411_v43  ;;  %v543_v43 = vcombine.high %v1545_v30, %v1545_v30 }
  0xef   : > { %v356_v53 = vadd.f32 %v354_v45, %v332_v47  ;;  %v357_v54 = vadd.f32 %v355_v46, %v333_v48  ;;  %v433_v55 = vpop.permute.xlu1 %432  ;;  %v431_v56 = vpop.permute.xlu0 %430 }
  0xf0   : > { %v435_v59 = vsel %vm434_vm11, %v431_v56, %v433_v55  ;;  %v436_v60 = vsel %vm434_vm11, %v433_v55, %v431_v56  ;;  %vm835_vm11 = vcmp.lt.s32.totalorder %v2082_v35, 126 }
  0xf1   : > { %v380_v61 = vadd.f32 %v378_v51, %v356_v53  ;;  %v381_v62 = vadd.f32 %v379_v52, %v357_v54  ;;  %1145 = vrot.lane.b32.xlu1 %v2023_v33, %s1873_s8  ;;  %1143 = vrot.lane.b32.xlu0 %v2019_v31, %s1873_s8  ;;  %v450_v14 = vmul.f32 %v1541_v49, %v436_v60  ;;  %s1761_s8 = scalar_lea.vmem %s1442_s7, 32 }
  0xf2   : > { %v451_v15 = vmul.f32 %v447_v58, %v435_v59  ;;  %v567_v53 = vcombine.high %v1546_v44, %v1546_v44  ;;  %p1762_p8 = scmp.ne.s32.totalorder %s1442_s7, %s1761_s8 }
  0xf3   : > { %v404_v3 = vadd.f32 %v402_v63, %v380_v61  ;;  %v405_v4 = vadd.f32 %v403_v0, %v381_v62  ;;  %v457_v7 = vpop.permute.xlu1 %456  ;;  %v455_v8 = vpop.permute.xlu0 %454 }
  0xf4   : > { %v459_v9 = vsel %vm458_vm12, %v455_v8, %v457_v7  ;;  %v460_v10 = vsel %vm458_vm12, %v457_v7, %v455_v8  ;;  %vm859_vm12 = vcmp.lt.s32.totalorder %v2082_v35, 125  ;;  %p1763_p11 = pnand %p1762_p8, %p2502_p3 }
  0xf5   : > { %v428_v12 = vadd.f32 %v426_v5, %v404_v3  ;;  %v429_v13 = vadd.f32 %v427_v6, %v405_v4  ;;  %1169 = vrot.lane.b32.xlu1 %v2023_v33, %s1874_s18  ;;  %1167 = vrot.lane.b32.xlu0 %v2019_v31, %s1874_s18  ;;  %v474_v19 = vmul.f32 %v1542_v57, %v460_v10  ;;  %s1884_s18 = smov [#allocation7]  }
  0xf6   : > { %v475_v20 = vmul.f32 %v471_v2, %v459_v9  ;;  %p1764_p7 = pneg %p1763_p11  ;;  %s1765_s13 = sshll.u32 %s1884_s18, 4  ;;  %s1766_s13 = int_to_ptr.vmem [resolvable:$false] %s1765_s13 }
  0xf7   : > { %v452_v17 = vadd.f32 %v450_v14, %v428_v12  ;;  %v453_v18 = vadd.f32 %v451_v15, %v429_v13  ;;  %v481_v21 = vpop.permute.xlu1 %480  ;;  %v479_v22 = vpop.permute.xlu0 %478  ;;  %p1768_p10 = scmp.lt.s32.totalorder %s1442_s7, %s1766_s13 }
  0xf8   : > { %v483_v23 = vsel %vm482_vm13, %v479_v22, %v481_v21  ;;  %v484_v24 = vsel %vm482_vm13, %v481_v21, %v479_v22  ;;  %vm883_vm13 = vcmp.lt.s32.totalorder %v2082_v35, 115 }
  0xf9   : > { %v476_v26 = vadd.f32 %v474_v19, %v452_v17  ;;  %v477_v27 = vadd.f32 %v475_v20, %v453_v18  ;;  %v498_v28 = vmul.f32 %v1543_v1, %v484_v24  ;;  %v499_v29 = vmul.f32 %v495_v11, %v483_v23  ;;  %1193 = vrot.lane.b32.xlu1 %v2023_v33, %s1875_s19 }
  0xfa   : > { %1191 = vrot.lane.b32.xlu0 %v2019_v31, %s1875_s19  ;;  %s1767_s19 = scalar_lea.vmem %s1766_s13, 64 }
  0xfb   : > { %v500_v32 = vadd.f32 %v498_v28, %v476_v26  ;;  %v501_v36 = vadd.f32 %v499_v29, %v477_v27  ;;  %v505_v37 = vpop.permute.xlu1 %504  ;;  %v503_v38 = vpop.permute.xlu0 %502  ;;  %v1547_v26 = vld.sshfl [vmem:[#allocation5 + $0x3c] sm:$0x33 pattern:$0x76325410]  ;;  %p1769_p2 = scmp.lt.s32.totalorder %s1767_s19, %s1761_s8 }
  0xfc   : > { %v507_v39 = vsel %vm506_vm14, %v503_v38, %v505_v37  ;;  %v508_v40 = vsel %vm506_vm14, %v505_v37, %v503_v38  ;;  %v1548_v29 = vld.sshfl [vmem:[#allocation5 + $0x40] sm:$0x33 pattern:$0x76325410]  ;;  %vm907_vm14 = vcmp.lt.s32.totalorder %v2082_v35, 114 }
  0xfd   : > { %v522_v41 = vmul.f32 %v1544_v16, %v508_v40  ;;  %v523_v42 = vmul.f32 %v519_v25, %v507_v39  ;;  %1217 = vrot.lane.b32.xlu1 %v2023_v33, %s1876_s20  ;;  %v1549_v37 = vld.sshfl [vmem:[#allocation5 + $0x44] sm:$0x33 pattern:$0x76325410]  ;;  %v615_v40 = vcombine.high %v1548_v29, %v1548_v29  ;;  %p1770_p13 = por %p1769_p2, %p1768_p10 }
  0xfe   : > { %1215 = vrot.lane.b32.xlu0 %v2019_v31, %s1876_s20 }
  0xff   : > { %v524_v45 = vadd.f32 %v522_v41, %v500_v32  ;;  %v525_v46 = vadd.f32 %v523_v42, %v501_v36  ;;  %v529_v47 = vpop.permute.xlu1 %528  ;;  %v527_v48 = vpop.permute.xlu0 %526  ;;  %p1771_p0 = pnand %p1770_p13, %p1764_p7 }
 0x100   : > { %v531_v49 = vsel %vm530_vm15, %v527_v48, %v529_v47  ;;  %v532_v50 = vsel %vm530_vm15, %v529_v47, %v527_v48  ;;  %v1551_v47 = vld.sshfl [vmem:[#allocation5 + $0x4c] sm:$0x33 pattern:$0x76325410]  ;;  %vm931_vm15 = vcmp.lt.s32.totalorder %v2082_v35, 113 }
 0x101   : > { %v546_v51 = vmul.f32 %v1545_v30, %v532_v50  ;;  %v547_v52 = vmul.f32 %v543_v43, %v531_v49  ;;  %1241 = vrot.lane.b32.xlu1 %v2023_v33, %s1877_s23  ;;  %v591_v30 = vcombine.high %v1547_v26, %v1547_v26  ;;  %v1550_v43 = vld.sshfl [vmem:[#allocation5 + $0x48] sm:$0x33 pattern:$0x76325410] }
 0x102   : > { %1239 = vrot.lane.b32.xlu0 %v2019_v31, %s1877_s23 }
 0x103   : > { %v548_v54 = vadd.f32 %v546_v51, %v524_v45  ;;  %v549_v55 = vadd.f32 %v547_v52, %v525_v46  ;;  %v553_v56 = vpop.permute.xlu1 %552  ;;  %v551_v57 = vpop.permute.xlu0 %550  ;;  %v639_v46 = vcombine.high %v1549_v37, %v1549_v37 }
 0x104   : > { %v555_v58 = vsel %vm554_vm0, %v551_v57, %v553_v56  ;;  %v556_v59 = vsel %vm554_vm0, %v553_v56, %v551_v57  ;;  %vm955_vm0 = vcmp.lt.s32.totalorder %v2082_v35, 112 }
 0x105   : > { %v570_v60 = vmul.f32 %v1546_v44, %v556_v59  ;;  %v571_v61 = vmul.f32 %v567_v53, %v555_v58  ;;  %1265 = vrot.lane.b32.xlu1 %v2023_v33, %s1878_s24  ;;  %v687_v58 = vcombine.high %v1551_v47, %v1551_v47 }
 0x106   : > { %1263 = vrot.lane.b32.xlu0 %v2019_v31, %s1878_s24 }
 0x107   : > { %v2149_v62 = vadd.f32 %v570_v60, %v548_v54  ;;  %v2151_v63 = vadd.f32 %v571_v61, %v549_v55  ;;  %v577_v0 = vpop.permute.xlu1 %576  ;;  %v575_v1 = vpop.permute.xlu0 %574  ;;  %v663_v54 = vcombine.high %v1550_v43, %v1550_v43  ;;  %v1552_v55 = vld.sshfl [vmem:[#allocation5 + $0x50] sm:$0x33 pattern:$0x76325410] }
 0x108   : > { %v579_v32 = vsel %vm578_vm1, %v575_v1, %v577_v0  ;;  %v580_v36 = vsel %vm578_vm1, %v577_v0, %v575_v1  ;;  %v1553_v1 = vld.sshfl [vmem:[#allocation5 + $0x54] sm:$0x33 pattern:$0x76325410]  ;;  %vm979_vm1 = vcmp.lt.s32.totalorder %v2082_v35, 111 }
 0x109   : > { %1289 = vrot.lane.b32.xlu1 %v2023_v33, %s1879_s25  ;;  %v594_v44 = vmul.f32 %v1547_v26, %v580_v36  ;;  %v595_v45 = vmul.f32 %v591_v30, %v579_v32  ;;  %v1554_v32 = vld.sshfl [vmem:[#allocation5 + $0x58] sm:$0x33 pattern:$0x76325410] }
 0x10a   : > { %1287 = vrot.lane.b32.xlu0 %v2019_v31, %s1879_s25 }
 0x10b   : > { %v601_v2 = vpop.permute.xlu1 %600  ;;  %v599_v3 = vpop.permute.xlu0 %598  ;;  %v596_v59 = vadd.f32 %v594_v44, %v2149_v62  ;;  %v597_v60 = vadd.f32 %v595_v45, %v2151_v63  ;;  %v759_v44 = vcombine.high %v1554_v32, %v1554_v32 }
 0x10c   : > { %v603_v41 = vsel %vm602_vm2, %v599_v3, %v601_v2  ;;  %v604_v42 = vsel %vm602_vm2, %v601_v2, %v599_v3  ;;  %vm1003_vm2 = vcmp.lt.s32.totalorder %v2082_v35, 110 }
 0x10d   : > { %1313 = vrot.lane.b32.xlu1 %v2023_v33, %s1880_s26  ;;  %v618_v52 = vmul.f32 %v1548_v29, %v604_v42  ;;  %v619_v53 = vmul.f32 %v615_v40, %v603_v41  ;;  %v1555_v41 = vld.sshfl [vmem:[#allocation5 + $0x5c] sm:$0x33 pattern:$0x76325410] }
 0x10e   : > { %1311 = vrot.lane.b32.xlu0 %v2019_v31, %s1880_s26 }
 0x10f   : > { %v625_v4 = vpop.permute.xlu1 %624  ;;  %v623_v5 = vpop.permute.xlu0 %622 }
 0x110   : > { %v627_v48 = vsel %vm626_vm3, %v623_v5, %v625_v4  ;;  %v628_v49 = vsel %vm626_vm3, %v625_v4, %v623_v5  ;;  %v711_v4 = vcombine.high %v1552_v55, %v1552_v55  ;;  %vm1027_vm3 = vcmp.lt.s32.totalorder %v2082_v35, 109 }
 0x111   : > { %1337 = vrot.lane.b32.xlu1 %v2023_v33, %s1881_s27  ;;  %v642_v61 = vmul.f32 %v1549_v37, %v628_v49  ;;  %v643_v0 = vmul.f32 %v639_v46, %v627_v48 }
 0x112   : > { %1335 = vrot.lane.b32.xlu0 %v2019_v31, %s1881_s27 }
 0x113   : > { %v649_v6 = vpop.permute.xlu1 %648  ;;  %v647_v7 = vpop.permute.xlu0 %646 }
 0x114   : > { %v651_v56 = vsel %vm650_vm4, %v647_v7, %v649_v6  ;;  %v652_v57 = vsel %vm650_vm4, %v649_v6, %v647_v7  ;;  %v620_v6 = vadd.f32 %v618_v52, %v596_v59  ;;  %v621_v7 = vadd.f32 %v619_v53, %v597_v60 }
 0x115   : > { %1361 = vrot.lane.b32.xlu1 %v2023_v33, %s1882_s28  ;;  %v666_v29 = vmul.f32 %v1550_v43, %v652_v57  ;;  %v667_v30 = vmul.f32 %v663_v54, %v651_v56  ;;  %v1556_v57 = vld.sshfl [vmem:[#allocation5 + $0x60] sm:$0x33 pattern:$0x76325410]  ;;  %vm1051_vm4 = vcmp.lt.s32.totalorder %v2082_v35, 99 }
 0x116   : > { %1359 = vrot.lane.b32.xlu0 %v2019_v31, %s1882_s28  ;;  %v645_v36 = vadd.f32 %v643_v0, %v621_v7  ;;  %v1557_v7 = vld.sshfl [vmem:[#allocation5 + $0x64] sm:$0x33 pattern:$0x76325410] }
 0x117   : > { %v673_v8 = vpop.permute.xlu1 %672  ;;  %v671_v9 = vpop.permute.xlu0 %670 }
 0x118   : > { %v675_v2 = vsel %vm674_vm5, %v671_v9, %v673_v8  ;;  %v676_v3 = vsel %vm674_vm5, %v673_v8, %v671_v9  ;;  %v735_v8 = vcombine.high %v1553_v1, %v1553_v1  ;;  %v644_v9 = vadd.f32 %v642_v61, %v620_v6 }
 0x119   : > { %v690_v37 = vmul.f32 %v1551_v47, %v676_v3  ;;  %v691_v40 = vmul.f32 %v687_v58, %v675_v2  ;;  %v669_v46 = vadd.f32 %v667_v30, %v645_v36  ;;  %vm1075_vm5 = vcmp.lt.s32.totalorder %v2082_v35, 98 }
 0x11a   : > { %v668_v45 = vadd.f32 %v666_v29, %v644_v9 }
 0x11b   : > { %v2161_v10 = vpop.permute.xlu1 %696  ;;  %v2163_v11 = vpop.permute.xlu0 %694  ;;  %v693_v53 = vadd.f32 %v691_v40, %v669_v46  ;;  %v1560_v46 = vld.sshfl [vmem:[#allocation5 + $0x70] sm:$0x33 pattern:$0x76325410] }
 0x11c   : > { %v699_v62 = vsel %vm698_vm6, %v2163_v11, %v2161_v10  ;;  %v700_v63 = vsel %vm698_vm6, %v2161_v10, %v2163_v11  ;;  %v692_v52 = vadd.f32 %v690_v37, %v668_v45  ;;  %v1559_v37 = vld.sshfl [vmem:[#allocation5 + $0x6c] sm:$0x33 pattern:$0x76325410]  ;;  %vm1099_vm6 = vcmp.lt.s32.totalorder %v2082_v35, 97 }
 0x11d   : > { %v714_v47 = vmul.f32 %v1552_v55, %v700_v63  ;;  %v715_v48 = vmul.f32 %v711_v4, %v699_v62  ;;  %v824_v63 = vcombine.high %v1557_v7, %v1557_v7  ;;  %v872_v45 = vcombine.high %v1559_v37, %v1559_v37 }
 0x11f   : > { %v2165_v12 = vpop.permute.xlu1 %720  ;;  %v2167_v13 = vpop.permute.xlu0 %718 }
 0x120   : > { %v723_v42 = vsel %vm722_vm7, %v2167_v13, %v2165_v12  ;;  %v724_v43 = vsel %vm722_vm7, %v2165_v12, %v2167_v13  ;;  %v783_v13 = vcombine.high %v1555_v41, %v1555_v41  ;;  %vm1123_vm7 = vcmp.lt.s32.totalorder %v2082_v35, 96 }
 0x121   : > { %v738_v54 = vmul.f32 %v1553_v1, %v724_v43  ;;  %v739_v56 = vmul.f32 %v735_v8, %v723_v42  ;;  %v800_v1 = vcombine.high %v1556_v57, %v1556_v57  ;;  %v1558_v8 = vld.sshfl [vmem:[#allocation5 + $0x68] sm:$0x33 pattern:$0x76325410] }
 0x122   : > { %v848_v43 = vcombine.high %v1558_v8, %v1558_v8 }
 0x123   : > { %v2169_v14 = vpop.permute.xlu1 %744  ;;  %v2171_v15 = vpop.permute.xlu0 %742  ;;  %v804_v36 = vmul.f32 %v800_v1, %v2023_v33 }
 0x124   : > { %v747_v49 = vsel %vm746_vm8, %v2171_v15, %v2169_v14  ;;  %v748_v12 = vsel %vm746_vm8, %v2169_v14, %v2171_v15  ;;  %v716_v14 = vadd.f32 %v714_v47, %v692_v52  ;;  %v717_v15 = vadd.f32 %v715_v48, %v693_v53 }
 0x125   : > { %v762_v61 = vmul.f32 %v1554_v32, %v748_v12  ;;  %v763_v0 = vmul.f32 %v759_v44, %v747_v49  ;;  %v1561_v49 = vld.sshfl [vmem:[#allocation5 + $0x74] sm:$0x33 pattern:$0x76325410]  ;;  %vm1147_vm8 = vcmp.lt.s32.totalorder %v2082_v35, 95 }
 0x126   : > { %v740_v2 = vadd.f32 %v738_v54, %v716_v14  ;;  %v741_v3 = vadd.f32 %v739_v56, %v717_v15 }
 0x127   : > { %v2173_v16 = vpop.permute.xlu1 %768  ;;  %v2175_v17 = vpop.permute.xlu0 %766 }
 0x128   : > { %v771_v55 = vsel %vm770_vm9, %v2175_v17, %v2173_v16  ;;  %v772_v58 = vsel %vm770_vm9, %v2173_v16, %v2175_v17  ;;  %v764_v62 = vadd.f32 %v762_v61, %v740_v2  ;;  %v765_v16 = vadd.f32 %v763_v0, %v741_v3  ;;  %v1563_v61 = vld.sshfl [vmem:[#allocation5 + $0x7c] sm:$0x33 pattern:$0x76325410] }
 0x129   : > { %v786_v4 = vmul.f32 %v1555_v41, %v772_v58  ;;  %v787_v6 = vmul.f32 %v783_v13, %v771_v55  ;;  %v803_v17 = vmul.f32 %v1556_v57, %v2019_v31  ;;  %vm1171_vm9 = vcmp.lt.s32.totalorder %v2082_v35, 94 }
 0x12b   : > { %v2177_v18 = vpop.permute.xlu1 %809  ;;  %v2179_v19 = vpop.permute.xlu0 %807  ;;  %v788_v32 = vadd.f32 %v786_v4, %v764_v62  ;;  %v789_v9 = vadd.f32 %v787_v6, %v765_v16 }
 0x12c   : > { %v812_v40 = vsel %vm811_vm10, %v2179_v19, %v2177_v18  ;;  %v813_v41 = vsel %vm811_vm10, %v2177_v18, %v2179_v19  ;;  %vm1195_vm10 = vcmp.lt.s32.totalorder %v2082_v35, 93 }
 0x12d   : > { %v805_v47 = vadd.f32 %v803_v17, %v788_v32  ;;  %v806_v48 = vadd.f32 %v804_v36, %v789_v9  ;;  %v827_v18 = vmul.f32 %v1557_v7, %v812_v40  ;;  %v828_v19 = vmul.f32 %v824_v63, %v813_v41  ;;  %v1564_v7 = vld.sshfl [vmem:[#allocation5 + $0x80] sm:$0x33 pattern:$0x76325410] }
 0x12e   : > { %v1565_v9 = vld.sshfl [vmem:[#allocation5 + $0x84] sm:$0x33 pattern:$0x76325410]  ;;  %v992_v40 = vcombine.high %v1564_v7, %v1564_v7 }
 0x12f   : > { %v2181_v20 = vpop.permute.xlu1 %833  ;;  %v2183_v21 = vpop.permute.xlu0 %831  ;;  %v829_v55 = vadd.f32 %v827_v18, %v805_v47  ;;  %v830_v58 = vadd.f32 %v828_v19, %v806_v48 }
 0x130   : > { %v836_v44 = vsel %vm835_vm11, %v2183_v21, %v2181_v20  ;;  %v837_v33 = vsel %vm835_vm11, %v2181_v20, %v2183_v21  ;;  %v896_v20 = vcombine.high %v1560_v46, %v1560_v46  ;;  %v1562_v21 = vld.sshfl [vmem:[#allocation5 + $0x78] sm:$0x33 pattern:$0x76325410]  ;;  %vm1219_vm11 = vcmp.lt.s32.totalorder %v2082_v35, 83 }
 0x131   : > { %v851_v53 = vmul.f32 %v1558_v8, %v836_v44  ;;  %v852_v54 = vmul.f32 %v848_v43, %v837_v33  ;;  %v944_v2 = vcombine.high %v1562_v21, %v1562_v21  ;;  %v1566_v33 = vld.sshfl [vmem:[#allocation5 + $0x88] sm:$0x33 pattern:$0x76325410] }
 0x133   : > { %v2185_v22 = vpop.permute.xlu1 %857  ;;  %v2187_v23 = vpop.permute.xlu0 %855 }
 0x134   : > { %v860_v12 = vsel %vm859_vm12, %v2187_v23, %v2185_v22  ;;  %v861_v13 = vsel %vm859_vm12, %v2185_v22, %v2187_v23  ;;  %v920_v23 = vcombine.high %v1561_v49, %v1561_v49  ;;  %vm1243_vm12 = vcmp.lt.s32.totalorder %v2082_v35, 82 }
 0x135   : > { %v875_v14 = vmul.f32 %v1559_v37, %v860_v12  ;;  %v876_v15 = vmul.f32 %v872_v45, %v861_v13 }
 0x137   : > { %v2189_v24 = vpop.permute.xlu1 %881  ;;  %v2191_v25 = vpop.permute.xlu0 %879 }
 0x138   : > { %v884_v57 = vsel %vm883_vm13, %v2191_v25, %v2189_v24  ;;  %v885_v22 = vsel %vm883_vm13, %v2189_v24, %v2191_v25  ;;  %v853_v24 = vadd.f32 %v851_v53, %v829_v55  ;;  %v854_v25 = vadd.f32 %v852_v54, %v830_v58 }
 0x139   : > { %v899_v4 = vmul.f32 %v1560_v46, %v884_v57  ;;  %v900_v6 = vmul.f32 %v896_v20, %v885_v22  ;;  %v1040_v53 = vcombine.high %v1566_v33, %v1566_v33  ;;  %v1568_v57 = vld.sshfl [vmem:[#allocation5 + $0x90] sm:$0x33 pattern:$0x76325410]  ;;  %vm1267_vm13 = vcmp.lt.s32.totalorder %v2082_v35, 81 }
 0x13a   : > { %v877_v17 = vadd.f32 %v875_v14, %v853_v24  ;;  %v878_v63 = vadd.f32 %v876_v15, %v854_v25 }
 0x13b   : > { %v2193_v27 = vpop.permute.xlu1 %905  ;;  %v2195_v28 = vpop.permute.xlu0 %903 }
 0x13c   : > { %v908_v0 = vsel %vm907_vm14, %v2195_v28, %v2193_v27  ;;  %v909_v1 = vsel %vm907_vm14, %v2193_v27, %v2195_v28  ;;  %v968_v28 = vcombine.high %v1563_v61, %v1563_v61  ;;  %v902_v41 = vadd.f32 %v900_v6, %v878_v63  ;;  %v1570_v6 = vld.sshfl [vmem:[#allocation5 + $0x98] sm:$0x33 pattern:$0x76325410] }
 0x13d   : > { %v923_v8 = vmul.f32 %v1561_v49, %v908_v0  ;;  %v924_v32 = vmul.f32 %v920_v23, %v909_v1  ;;  %v1567_v49 = vld.sshfl [vmem:[#allocation5 + $0x8c] sm:$0x33 pattern:$0x76325410]  ;;  %vm1291_vm14 = vcmp.lt.s32.totalorder %v2082_v35, 80 }
 0x13f   : > { %v2199_v38 = vpop.permute.xlu1 %929  ;;  %v2201_v39 = vpop.permute.xlu0 %927  ;;  %v926_v48 = vadd.f32 %v924_v32, %v902_v41  ;;  %v1572_v41 = vld.sshfl [vmem:[#allocation5 + $0xa0] sm:$0x33 pattern:$0x76325410] }
 0x140   : > { %v932_v16 = vsel %vm931_vm15, %v2201_v39, %v2199_v38  ;;  %v933_v27 = vsel %vm931_vm15, %v2199_v38, %v2201_v39  ;;  %v901_v39 = vadd.f32 %v899_v4, %v877_v17  ;;  %vm1315_vm15 = vcmp.lt.s32.totalorder %v2082_v35, 79 }
 0x141   : > { %v947_v43 = vmul.f32 %v1562_v21, %v932_v16  ;;  %v948_v44 = vmul.f32 %v944_v2, %v933_v27  ;;  %v1088_v2 = vcombine.high %v1568_v57, %v1568_v57 }
 0x142   : > { %v925_v47 = vadd.f32 %v923_v8, %v901_v39  ;;  %v1571_v8 = vld.sshfl [vmem:[#allocation5 + $0x9c] sm:$0x33 pattern:$0x76325410] }
 0x143   : > { %v2205_v50 = vpop.permute.xlu1 %953  ;;  %v2207_v51 = vpop.permute.xlu0 %951  ;;  %v950_v54 = vadd.f32 %v948_v44, %v926_v48 }
 0x144   : > { %v956_v36 = vsel %vm955_vm0, %v2207_v51, %v2205_v50  ;;  %v957_v37 = vsel %vm955_vm0, %v2205_v50, %v2207_v51  ;;  %v1016_v51 = vcombine.high %v1565_v9, %v1565_v9  ;;  %vm1339_vm0 = vcmp.lt.s32.totalorder %v2082_v35, 78 }
 0x145   : > { %v971_v18 = vmul.f32 %v1563_v61, %v956_v36  ;;  %v972_v19 = vmul.f32 %v968_v28, %v957_v37  ;;  %v1569_v61 = vld.sshfl [vmem:[#allocation5 + $0x94] sm:$0x33 pattern:$0x76325410]  ;;  %v1136_v36 = vcombine.high %v1570_v6, %v1570_v6 }
 0x147   : > { %v2214_v5 = vpop.permute.xlu1 %977  ;;  %v2216_v26 = vpop.permute.xlu0 %975  ;;  %v974_v58 = vadd.f32 %v972_v19, %v950_v54  ;;  %v1184_v19 = vcombine.high %v1572_v41, %v1572_v41 }
 0x148   : > { %v980_v46 = vsel %vm979_vm1, %v2216_v26, %v2214_v5  ;;  %v981_v50 = vsel %vm979_vm1, %v2214_v5, %v2216_v26  ;;  %v949_v26 = vadd.f32 %v947_v43, %v925_v47  ;;  %v1573_v47 = vld.sshfl [vmem:[#allocation5 + $0xa4] sm:$0x33 pattern:$0x76325410]  ;;  %vm1363_vm1 = vcmp.lt.s32.totalorder %v2082_v35, 77 }
 0x149   : > { %v995_v20 = vmul.f32 %v1564_v7, %v980_v46  ;;  %v996_v21 = vmul.f32 %v992_v40, %v981_v50 }
 0x14a   : > { %v973_v55 = vadd.f32 %v971_v18, %v949_v26 }
 0x14b   : > { %v2236_v10 = vpop.permute.xlu1 %1001  ;;  %v2238_v11 = vpop.permute.xlu0 %999  ;;  %v998_v24 = vadd.f32 %v996_v21, %v974_v58 }
 0x14c   : > { %v1004_v12 = vsel %vm1003_vm2, %v2238_v11, %v2236_v10  ;;  %v1005_v13 = vsel %vm1003_vm2, %v2236_v10, %v2238_v11  ;;  %v1064_v11 = vcombine.high %v1567_v49, %v1567_v49  ;;  %vm1423_vm2 = vcmp.lt.s32.totalorder %v217_v34, 256 }
 0x14d   : > { %v1019_v14 = vmul.f32 %v1565_v9, %v1004_v12  ;;  %v1020_v15 = vmul.f32 %v1016_v51, %v1005_v13 }
 0x14f   : > { %v2256_v59 = vpop.permute.xlu1 %1025  ;;  %v2258_v60 = vpop.permute.xlu0 %1023  ;;  %v1022_v28 = vadd.f32 %v1020_v15, %v998_v24 }
 0x150   : > { %v1028_v23 = vsel %vm1027_vm3, %v2258_v60, %v2256_v59  ;;  %v1029_v10 = vsel %vm1027_vm3, %v2256_v59, %v2258_v60  ;;  %v997_v60 = vadd.f32 %v995_v20, %v973_v55 }
 0x151   : > { %v1043_v25 = vmul.f32 %v1566_v33, %v1028_v23  ;;  %v1044_v4 = vmul.f32 %v1040_v53, %v1029_v10  ;;  %v1574_v53 = vld.sshfl [vmem:[#allocation5 + $0xa8] sm:$0x33 pattern:$0x76325410] }
 0x152   : > { %v1021_v27 = vadd.f32 %v1019_v14, %v997_v60  ;;  %v1575_v10 = vld.sshfl [vmem:[#allocation5 + $0xac] sm:$0x33 pattern:$0x76325410]  ;;  %v1232_v58 = vcombine.high %v1574_v53, %v1574_v53 }
 0x153   : > { %v2260_v29 = vpop.permute.xlu1 %1049  ;;  %v2262_v30 = vpop.permute.xlu0 %1047  ;;  %v1046_v37 = vadd.f32 %v1044_v4, %v1022_v28  ;;  %v1256_v24 = vcombine.high %v1575_v10, %v1575_v10 }
 0x154   : > { %v1052_v0 = vsel %vm1051_vm4, %v2262_v30, %v2260_v29  ;;  %v1053_v1 = vsel %vm1051_vm4, %v2260_v29, %v2262_v30  ;;  %v1112_v30 = vcombine.high %v1569_v61, %v1569_v61 }
 0x155   : > { %v1067_v17 = vmul.f32 %v1567_v49, %v1052_v0  ;;  %v1068_v63 = vmul.f32 %v1064_v11, %v1053_v1  ;;  %v1576_v0 = vld.sshfl [vmem:[#allocation5 + $0xb0] sm:$0x33 pattern:$0x76325410] }
 0x157   : > { %v2272_v42 = vpop.permute.xlu1 %1073  ;;  %v2275_v31 = vpop.permute.xlu0 %1071  ;;  %v1070_v46 = vadd.f32 %v1068_v63, %v1046_v37 }
 0x158   : > { %v1076_v16 = vsel %vm1075_vm5, %v2275_v31, %v2272_v42  ;;  %v1077_v29 = vsel %vm1075_vm5, %v2272_v42, %v2275_v31  ;;  %v1045_v31 = vadd.f32 %v1043_v25, %v1021_v27 }
 0x159   : > { %v1091_v40 = vmul.f32 %v1568_v57, %v1076_v16  ;;  %v1092_v39 = vmul.f32 %v1088_v2, %v1077_v29 }
 0x15a   : > { %v1069_v33 = vadd.f32 %v1067_v17, %v1045_v31 }
 0x15b   : > { %v2286_v52 = vpop.permute.xlu1 %1097  ;;  %v2289_v56 = vpop.permute.xlu0 %1095  ;;  %v1094_v49 = vadd.f32 %v1092_v39, %v1070_v46 }
 0x15c   : > { %v1100_v32 = vsel %vm1099_vm6, %v2289_v56, %v2286_v52  ;;  %v1101_v9 = vsel %vm1099_vm6, %v2286_v52, %v2289_v56  ;;  %v1160_v56 = vcombine.high %v1571_v8, %v1571_v8 }
 0x15d   : > { %v1115_v50 = vmul.f32 %v1569_v61, %v1100_v32  ;;  %v1116_v51 = vmul.f32 %v1112_v30, %v1101_v9  ;;  %v1280_v30 = vcombine.high %v1576_v0, %v1576_v0  ;;  %v1578_v9 = vld.sshfl [vmem:[#allocation5 + $0xb8] sm:$0x33 pattern:$0x76325410] }
 0x15f   : > { %v2305_v3 = vpop.permute.xlu1 %1121  ;;  %v2307_v62 = vpop.permute.xlu0 %1119  ;;  %v1118_v21 = vadd.f32 %v1116_v51, %v1094_v49 }
 0x160   : > { %v1124_v44 = vsel %vm1123_vm7, %v2307_v62, %v2305_v3  ;;  %v1125_v52 = vsel %vm1123_vm7, %v2305_v3, %v2307_v62  ;;  %v1093_v62 = vadd.f32 %v1091_v40, %v1069_v33  ;;  %v1328_v33 = vcombine.high %v1578_v9, %v1578_v9 }
 0x161   : > { %v1139_v12 = vmul.f32 %v1570_v6, %v1124_v44  ;;  %v1140_v13 = vmul.f32 %v1136_v36, %v1125_v52 }
 0x162   : > { %v1117_v20 = vadd.f32 %v1115_v50, %v1093_v62 }
 0x163   : > { %v2327_v38 = vpop.permute.xlu1 %1145  ;;  %v2329_v45 = vpop.permute.xlu0 %1143 }
 0x164   : > { %v1148_v48 = vsel %vm1147_vm8, %v2329_v45, %v2327_v38  ;;  %v1149_v18 = vsel %vm1147_vm8, %v2327_v38, %v2329_v45  ;;  %v1208_v45 = vcombine.high %v1573_v47, %v1573_v47  ;;  %v1141_v15 = vadd.f32 %v1139_v12, %v1117_v20 }
 0x165   : > { %v1163_v57 = vmul.f32 %v1571_v8, %v1148_v48  ;;  %v1164_v23 = vmul.f32 %v1160_v56, %v1149_v18 }
 0x167   : > { %v2349_v5 = vpop.permute.xlu1 %1169  ;;  %v2351_v22 = vpop.permute.xlu0 %1167 }
 0x168   : > { %v1172_v54 = vsel %vm1171_vm9, %v2351_v22, %v2349_v5  ;;  %v1173_v38 = vsel %vm1171_vm9, %v2349_v5, %v2351_v22  ;;  %v1142_v5 = vadd.f32 %v1140_v13, %v1118_v21 }
 0x169   : > { %v1187_v22 = vmul.f32 %v1572_v41, %v1172_v54  ;;  %v1188_v61 = vmul.f32 %v1184_v19, %v1173_v38 }
 0x16a   : > { %v1166_v25 = vadd.f32 %v1164_v23, %v1142_v5 }
 0x16b   : > { %v1194_v59 = vpop.permute.xlu1 %1193 }
 0x16c   : > { %v1192_v7 = vpop.permute.xlu0 %1191  ;;  %v1190_v17 = vadd.f32 %v1188_v61, %v1166_v25 }
 0x16d   : > { %v1196_v11 = vsel %vm1195_vm10, %v1192_v7, %v1194_v59  ;;  %v1197_v55 = vsel %vm1195_vm10, %v1194_v59, %v1192_v7  ;;  %v1165_v59 = vadd.f32 %v1163_v57, %v1141_v15  ;;  %v1577_v7 = vld.sshfl [vmem:[#allocation5 + $0xb4] sm:$0x33 pattern:$0x76325410] }
 0x16e   : > { %v1211_v4 = vmul.f32 %v1573_v47, %v1196_v11  ;;  %v1212_v6 = vmul.f32 %v1208_v45, %v1197_v55  ;;  %v1304_v31 = vcombine.high %v1577_v7, %v1577_v7 }
 0x16f   : > { %v1218_v42 = vpop.permute.xlu1 %1217  ;;  %v1189_v28 = vadd.f32 %v1187_v22, %v1165_v59 }
 0x170   : > { %v1216_v43 = vpop.permute.xlu0 %1215  ;;  %v1214_v40 = vadd.f32 %v1212_v6, %v1190_v17 }
 0x171   : > { %v1220_v2 = vsel %vm1219_vm11, %v1216_v43, %v1218_v42  ;;  %v1221_v60 = vsel %vm1219_vm11, %v1218_v42, %v1216_v43  ;;  %v1213_v37 = vadd.f32 %v1211_v4, %v1189_v28  ;;  %v1579_v43 = vld.sshfl [vmem:[#allocation5 + $0xbc] sm:$0x33 pattern:$0x76325410] }
 0x172   : > { %v1235_v63 = vmul.f32 %v1574_v53, %v1220_v2  ;;  %v1236_v8 = vmul.f32 %v1232_v58, %v1221_v60  ;;  %v1580_v53 = vld.sshfl [vmem:[#allocation5 + $0xc0] sm:$0x33 pattern:$0x76325410] }
 0x173   : > { %v1242_v3 = vpop.permute.xlu1 %1241 }
 0x174   : > { %v1240_v26 = vpop.permute.xlu0 %1239  ;;  %v1237_v46 = vadd.f32 %v1235_v63, %v1213_v37  ;;  %v1238_v50 = vadd.f32 %v1236_v8, %v1214_v40  ;;  %v1883_v8 = vmov 1966171168  }
 0x175   : > { %v1244_v16 = vsel %vm1243_vm12, %v1240_v26, %v1242_v3  ;;  %v1245_v29 = vsel %vm1243_vm12, %v1242_v3, %v1240_v26  ;;  %v1352_v3 = vcombine.high %v1579_v43, %v1579_v43 }
 0x176   : > { %v1259_v39 = vmul.f32 %v1575_v10, %v1244_v16  ;;  %v1260_v41 = vmul.f32 %v1256_v24, %v1245_v29  ;;  %v1376_v10 = vcombine.high %v1580_v53, %v1580_v53 }
 0x177   : > { %v1266_v14 = vpop.permute.xlu1 %1265 }
 0x178   : > { %v1264_v1 = vpop.permute.xlu0 %1263  ;;  %v1261_v62 = vadd.f32 %v1259_v39, %v1237_v46  ;;  %v1262_v49 = vadd.f32 %v1260_v41, %v1238_v50 }
 0x179   : > { %v1268_v36 = vsel %vm1267_vm13, %v1264_v1, %v1266_v14  ;;  %v1269_v42 = vsel %vm1267_vm13, %v1266_v14, %v1264_v1 }
 0x17a   : > { %v1283_v51 = vmul.f32 %v1576_v0, %v1268_v36  ;;  %v1284_v47 = vmul.f32 %v1280_v30, %v1269_v42  ;;  %v1410_v36 = vshrl.u32 %v217_v34, 7 }
 0x17b   : > { %v1290_v27 = vpop.permute.xlu1 %1289 }
 0x17c   : > { %v1288_v32 = vpop.permute.xlu0 %1287  ;;  %v1285_v54 = vadd.f32 %v1283_v51, %v1261_v62  ;;  %v1286_v38 = vadd.f32 %v1284_v47, %v1262_v49 }
 0x17d   : > { %v1292_v44 = vsel %vm1291_vm14, %v1288_v32, %v1290_v27  ;;  %v1293_v52 = vsel %vm1291_vm14, %v1290_v27, %v1288_v32  ;;  %v1407_v32 = vunpack.c.l.s4 %v1883_v8 }
 0x17e   : > { %v1307_v12 = vmul.f32 %v1577_v7, %v1292_v44  ;;  %v1308_v13 = vmul.f32 %v1304_v31, %v1293_v52 }
 0x17f   : > { %v1314_v56 = vpop.permute.xlu1 %1313 }
 0x180   : > { %v1312_v48 = vpop.permute.xlu0 %1311  ;;  %v1309_v11 = vadd.f32 %v1307_v12, %v1285_v54  ;;  %v1310_v55 = vadd.f32 %v1308_v13, %v1286_v38 }
 0x181   : > { %v1316_v18 = vsel %vm1315_vm15, %v1312_v48, %v1314_v56  ;;  %v1317_v19 = vsel %vm1315_vm15, %v1314_v56, %v1312_v48 }
 0x182   : > { %v1331_v45 = vmul.f32 %v1578_v9, %v1316_v18  ;;  %v1332_v20 = vmul.f32 %v1328_v33, %v1317_v19  ;;  %v1408_v9 = vunpack.c.0.s8 %v1407_v32 }
 0x183   : > { %v1338_v26 = vpop.permute.xlu1 %1337 }
 0x184   : > { %v1336_v21 = vpop.permute.xlu0 %1335  ;;  %v1333_v5 = vadd.f32 %v1331_v45, %v1309_v11  ;;  %v1334_v22 = vadd.f32 %v1332_v20, %v1310_v55  ;;  %v1411_v31 = vsub.s32 %v1408_v9, %v1410_v36 }
 0x185   : > { %v1340_v57 = vsel %vm1339_vm0, %v1336_v21, %v1338_v26  ;;  %v1341_v23 = vsel %vm1339_vm0, %v1338_v26, %v1336_v21 }
 0x186   : > { %v1355_v58 = vmul.f32 %v1579_v43, %v1340_v57  ;;  %v1356_v14 = vmul.f32 %v1352_v3, %v1341_v23 }
 0x187   : > { %v1362_v15 = vpop.permute.xlu1 %1361 }
 0x188   : > { %v1360_v61 = vpop.permute.xlu0 %1359  ;;  %v1357_v2 = vadd.f32 %v1355_v58, %v1333_v5  ;;  %v1358_v60 = vadd.f32 %v1356_v14, %v1334_v22 }
 0x189   : > { %v1364_v0 = vsel %vm1363_vm1, %v1360_v61, %v1362_v15  ;;  %v1365_v1 = vsel %vm1363_vm1, %v1362_v15, %v1360_v61 }
 0x18a   : > { %v1379_v24 = vmul.f32 %v1580_v53, %v1364_v0  ;;  %v1380_v59 = vmul.f32 %v1376_v10, %v1365_v1 }
 0x18c   : > { %v1381_v25 = vadd.f32 %v1379_v24, %v1357_v2  ;;  %v1382_v4 = vadd.f32 %v1380_v59, %v1358_v60 }
 0x18e   : > { %v1385_v6 = vrot.slane %v1381_v25, 1  ;;  %v1386_v7 = vrot.slane %v1382_v4, 1 }
 0x190   : > { %v1389_v35 = vadd.f32 %v1385_v6, %v1381_v25  ;;  %v1390_v16 = vadd.f32 %v1386_v7, %v1382_v4 }
 0x192   : > { %v1581_v29 = vmul.f32 -1.442695, %v1389_v35  ;;  %v1582_v30 = vmul.f32 -1.442695, %v1390_v16 }
 0x194   : > { %1699 = vpow2.f32 %v1581_v29 }
 0x195   : > { %1701 = vpow2.f32 %v1582_v30 }
 0x1a1   : > { %v1700_v27 = vpop.eup %1699 }
 0x1a2   : > { %v1702_v28 = vpop.eup %1701  ;;  %v1397_v17 = vadd.f32 1.0, %v1700_v27 }
 0x1a3   : > { %v1398_v63 = vadd.f32 1.0, %v1702_v28 }
 0x1a4   : > { %1703 = vrcp.f32 %v1397_v17 }
 0x1a5   : > { %1705 = vrcp.f32 %v1398_v63 }
 0x1b1   : > { %v1704_v42 = vpop.eup %1703 }
 0x1b2   : > { %v1706_v37 = vpop.eup %1705 }
 0x1b3   : > { %v1405_v40 = vcombine.low %v1704_v42, %v1706_v37 }
 0x1b5   : > { %v1412_v39 = vrot.slane %v1405_v40, %v1411_v31 }
 0x1b7   : > { %v1419_v41 = vrot.slane %v1412_v39, %v1411_v31 }
 0x1b9   : > { %1425 = vst.msk [vmem:[%s174_s5] sm:$0x3] %vm1423_vm2, %v1419_v41 }
 0x1ba   : > { %1774 = shalt.err (!%p1771_p0)
}
 0x1bb   : > { %s1775_s20 = scalar_lea.hbm %s1439_s15, 32  ;;  %s1779_s24 = scalar_lea.hbm %s2486_s2, 64 }
 0x1bc   : > { %p1776_p5 = scmp.ne.s32.totalorder %s1439_s15, %s1775_s20  ;;  %p1780_p1 = scmp.lt.s32.totalorder %s1439_s15, %s2486_s2 }
 0x1bd   : > { %p1781_p4 = scmp.lt.s32.totalorder %s1779_s24, %s1775_s20 }
 0x1be   : > { %p1777_p9 = pnand %p1776_p5, %p2502_p3 }
 0x1bf   : > { %p1782_p6 = por %p1781_p4, %p1780_p1 }
 0x1c0   : > { %p1778_p12 = pneg %p1777_p9 }
 0x1c2   : > { %p1783_p8 = pnand %p1782_p6, %p1778_p12 }
 0x1c4   : > { %1786 = shalt.err (!%p1783_p8)
}
 0x1c5   : > { %1596 = dma.vmem_to_hbm [thread:$0]  (%p2502_p3), %s1442_s7, 32, %s1439_s15, %s1427_s17  }
 0x1c6 PF: > { %s1453_s27 = sand.u32 1, %s1817_s9   ;;  %p2503_p11 = scmp.ne.s32.totalorder %s2492_s16, 0 }
 0x1c7   : > { %p2504_p7 = scmp.ge.s32.totalorder %s1829_s12, 2  ;;  %s1454_s28 = scalar_lea.sflag [#allocation4], %s1453_s27 }
 0x1c9   : > { %p1607_p10 = pnand %p2504_p7, %p2503_p11 }
 0x1cb   : > { %p1608_p2 = pneg %p1607_p10 }
 0x1cd   : > { %1812 = dma.done.wait (%p1608_p2), %s1454_s28, 32  }
 0x1ce   : > { %1814 = vsyncadd (%p1608_p2), %s1454_s28, 4294967264  ;;  %p16_p13 = scmp.ge.s32.totalorder %s1954_s21, 4   ;;  %s2505_s9 = smov %s1821_s10 }
 0x1cf   : > { %s2506_s10 = smov %s1825_s11  ;;  %s2507_s11 = smov %s1971_s29 }
 0x1d0   : > { %s2508_s12 = smov %s1954_s21  ;;  %18 = sbr.rel (!%p16_p13) target bundleno = 6 (0x6), region = 125 }
 0x1d5   :  { %1459 = vsyncpa [#allocation3], 1 }
 0x1d6   :  { %1461 = vsyncpa [#allocation3 + $0x1], 1 }
 0x1d7   :  { %1462 = vsyncpa [#allocation6], 1 }
 0x1d8   :  { %1463 = vsyncpa [#allocation4], 1 }
 0x1d9   :  { %1465 = vsyncpa [#allocation4 + $0x1], 1 }

</bundles_post_ra>
